<compile_context>
chip_gen: v6e
topology: v6e:2x2x1
jax: 0.10.0
libtpu: 0.0.40
codegen_flags: <defaults>
</compile_context>

<pallas_src>
import functools
import math

import jax
import jax.numpy as jnp
from jax.experimental import pallas as pl
from jax.experimental.pallas import tpu as pltpu

PARAM_HIDDEN = 32
PARAM_LAYERS = 4
COORD_HIDDEN = 16
COORD_LAYERS = 3
DEC_HIDDEN = 64
DEC_LAYERS = 6

PARAM_IN = 5
IN_ROWS = 8  # input slab rows: [m, mu, k, y0, v0, t, 1, 0]
ENC_STACK = PARAM_HIDDEN + COORD_HIDDEN  # 48


# ----------------------------------------------------------------------------
# Parameter init (PyTorch nn.Linear style), original orientation
# (fan_in, fan_out) / (1, fan_out).
# ----------------------------------------------------------------------------
def _linear_init(key, fan_in, fan_out):
    kw, kb = jax.random.split(key)
    bound = 1.0 / math.sqrt(fan_in)
    w = jax.random.uniform(kw, (fan_in, fan_out), jnp.float32, -bound, bound)
    b = jax.random.uniform(kb, (1, fan_out), jnp.float32, -bound, bound)
    return w, b


def init_params(key):
    n_layers = PARAM_LAYERS + COORD_LAYERS + (DEC_LAYERS + 1)
    keys = jax.random.split(key, n_layers)
    ki = iter(keys)
    pe = [_linear_init(next(ki), PARAM_IN, PARAM_HIDDEN)]
    for _ in range(PARAM_LAYERS - 1):
        pe.append(_linear_init(next(ki), PARAM_HIDDEN, PARAM_HIDDEN))
    ce = [_linear_init(next(ki), 1, COORD_HIDDEN)]
    for _ in range(COORD_LAYERS - 1):
        ce.append(_linear_init(next(ki), COORD_HIDDEN, COORD_HIDDEN))
    dec = [_linear_init(next(ki), PARAM_HIDDEN + COORD_HIDDEN, DEC_HIDDEN)]
    for _ in range(DEC_LAYERS - 1):
        dec.append(_linear_init(next(ki), DEC_HIDDEN, DEC_HIDDEN))
    dec.append(_linear_init(next(ki), DEC_HIDDEN, 1))
    return pe, ce, dec


# ----------------------------------------------------------------------------
# Host-side weight packing into a few transposed, fan-in-grouped slabs.
# All padding rows/cols are exact zeros -> mathematically identical to the
# reference (modulo f32 accumulation order).
# ----------------------------------------------------------------------------
def pack_params(pe, ce, dec, weight_dtype=jnp.float32):
    f32 = jnp.float32

    def T(w):
        return jnp.asarray(w, f32).T

    # slab_a (48, 8): fused layer 0 of both encoders, biases folded into col 6.
    wpe0 = T(pe[0][0])                                            # (32, 5)
    bpe0 = jnp.asarray(pe[0][1], f32).reshape(PARAM_HIDDEN, 1)
    wce0 = T(ce[0][0])                                            # (16, 1)
    bce0 = jnp.asarray(ce[0][1], f32).reshape(COORD_HIDDEN, 1)
    z32 = jnp.zeros((PARAM_HIDDEN, 1), f32)
    z16 = jnp.zeros((COORD_HIDDEN, 1), f32)
    row_pe = jnp.concatenate([wpe0, z32, bpe0, z32], axis=1)      # cols: W(0..4), 0, b, 0
    row_ce = jnp.concatenate(
        [jnp.zeros((COORD_HIDDEN, PARAM_IN), f32), wce0, bce0, z16], axis=1
    )                                                             # cols: 0..0, W_t, b, 0
    slab_a = jnp.concatenate([row_pe, row_ce], axis=0)            # (48, 8)

    # slab_bd (96, 48): block-diagonal [Wpe_l^T 0 ; 0 Wce_l^T] for l = 1, 2.
    blocks = []
    for l in (1, 2):
        top = jnp.concatenate(
            [T(pe[l][0]), jnp.zeros((PARAM_HIDDEN, COORD_HIDDEN), f32)], axis=1)
        bot = jnp.concatenate(
            [jnp.zeros((COORD_HIDDEN, PARAM_HIDDEN), f32), T(ce[l][0])], axis=1)
        blocks.append(jnp.concatenate([top, bot], axis=0))        # (48, 48)
    slab_bd = jnp.concatenate(blocks, axis=0)                     # (96, 48)

    # slab_k32 (96, 32): pe layer 3, then decoder-0 param-half.
    slab_k32 = jnp.concatenate(
        [T(pe[3][0]), T(dec[0][0][:PARAM_HIDDEN, :])], axis=0)    # (32+64, 32)

    # slab_k16 (64, 16): decoder-0 coord-half.
    slab_k16 = T(dec[0][0][PARAM_HIDDEN:, :])                     # (64, 16)

    # slab_d (328, 64): decoder layers 1..5, then final (1,64) row padded to 8.
    wd_last = jnp.pad(T(dec[-1][0]), ((0, 7), (0, 0)))            # (8, 64)
    slab_d = jnp.concatenate(
        [T(dec[l][0]) for l in range(1, DEC_LAYERS)] + [wd_last], axis=0)  # (328, 64)

    # bias slab (64, 16) f32:
    #  col 0,1: stacked [b_pe_l; b_ce_l] for encoder layers 1,2
    #  col 2  : b_pe3
    #  col 3-8: b_dec0 .. b_dec5
    #  col 9  : b_out (row 0)
    def col(vec, rows=64):
        v = jnp.asarray(vec, f32).reshape(-1, 1)
        return jnp.pad(v, ((0, rows - v.shape[0]), (0, 0)))

    cols = [
        col(jnp.concatenate([jnp.asarray(pe[1][1], f32).reshape(-1),
                             jnp.asarray(ce[1][1], f32).reshape(-1)])),
        col(jnp.concatenate([jnp.asarray(pe[2][1], f32).reshape(-1),
                             jnp.asarray(ce[2][1], f32).reshape(-1)])),
        col(pe[3][1]),
    ]
    for l in range(DEC_LAYERS):
        cols.append(col(dec[l][1]))
    cols.append(col(dec[-1][1]))
    while len(cols) < 16:
        cols.append(jnp.zeros((64, 1), f32))
    bias = jnp.concatenate(cols, axis=1)                          # (64, 16)

    wdt = weight_dtype
    return (slab_a.astype(wdt), slab_bd.astype(wdt), slab_k32.astype(wdt),
            slab_k16.astype(wdt), slab_d.astype(wdt), bias)


# ----------------------------------------------------------------------------
# Fused kernel: whole MLP for one (8, tb) batch tile, transposed layout.
# ----------------------------------------------------------------------------
def p2inn_kernel(x_ref, wa_ref, wbd_ref, w32_ref, w16_ref, wd_ref, b_ref,
                 out_ref, *, act_dtype):
    x = x_ref[...]        # (8, tb) f32: rows [m, mu, k, y0, v0, t, 1, 0]
    b = b_ref[...]        # (64, 16) f32 packed bias columns

    def mm(w, h):
        # weights arrive pre-cast host-side (f32 or bf16); cast activations to
        # match (no-op when dtypes already agree), accumulate in f32 on the MXU.
        return jnp.dot(w, h.astype(w.dtype), preferred_element_type=jnp.float32)

    def act(z):
        # tanh in act_dtype (bf16 on v6e/v7x halves EUP pushes; f32 otherwise)
        return jnp.tanh(z.astype(act_dtype))

    # ---- fused layer 0 of both encoders (biases folded via input row 6) ----
    h48 = act(mm(wa_ref[...], x))                                  # (48, tb)

    # ---- encoder layers 1..2: block-diag [pe_l ; ce_l] on stacked activation ----
    for l in (1, 2):
        off = (l - 1) * ENC_STACK
        h48 = act(mm(wbd_ref[off:off + ENC_STACK, :], h48) + b[0:ENC_STACK, l - 1:l])

    # ---- param-encoder layer 3 (coord encoder finished after layer 2) ----
    h_p = act(mm(w32_ref[0:PARAM_HIDDEN, :], h48[0:PARAM_HIDDEN, :])
              + b[0:PARAM_HIDDEN, 2:3])                            # (32, tb)
    h_c = h48[PARAM_HIDDEN:ENC_STACK, :]                           # (16, tb)

    # ---- decoder layer 0: W^T @ [h_p; h_c] as two partial matmuls ----
    h = act(mm(w32_ref[PARAM_HIDDEN:PARAM_HIDDEN + DEC_HIDDEN, :], h_p)
            + mm(w16_ref[...], h_c) + b[:, 3:4])                   # (64, tb)

    # ---- decoder layers 1..5 ----
    for l in range(1, DEC_LAYERS):
        off = (l - 1) * DEC_HIDDEN
        h = act(mm(wd_ref[off:off + DEC_HIDDEN, :], h) + b[:, 3 + l:4 + l])

    # ---- final linear (no activation): rows 320..327 hold [w_out^T ; zeros] ----
    y = mm(wd_ref[320:328, :], h)[0:1, :] + b[0:1, 9:10]           # (1, tb) f32
    out_ref[...] = y.astype(out_ref.dtype)


# ----------------------------------------------------------------------------
# Wrapper
# ----------------------------------------------------------------------------
def _choose_tile(batch, tb_max):
    assert tb_max % 128 == 0
    # lane-dense (multiple of 128), capped, and aiming at >= 2 (even) grid
    # steps when the batch allows so both v7x TensorCores get work.
    half = -(-batch // 2)
    tb = -(-half // 128) * 128
    return max(128, min(tb_max, tb))


def p2inn_forward(pe, ce, dec, t, m, mu, k, y0, v0, *, precision="f32",
                  tb_max=None):
    assert precision in ("f32", "bf16_mxu", "bf16")
    weight_dtype = jnp.float32 if precision == "f32" else jnp.bfloat16
    act_dtype = jnp.bfloat16 if precision == "bf16" else jnp.float32
    if tb_max is None:
        # f32 activations keep vreg pressure moderate at 512; bf16 halves it.
        tb_max = 1024 if act_dtype == jnp.bfloat16 else 512

    orig_shape = t.shape
    batch = math.prod(orig_shape[:-1])

    def row(x):
        return x.reshape(batch).astype(jnp.float32)

    ones = jnp.ones((batch,), jnp.float32)
    zeros = jnp.zeros((batch,), jnp.float32)
    eq_t = jnp.stack(
        [row(m), row(mu), row(k), row(y0), row(v0), row(t), ones, zeros], axis=0
    )                                                              # (8, batch)

    tb = _choose_tile(batch, tb_max)
    bp = pl.cdiv(batch, tb) * tb
    if bp != batch:
        eq_t = jnp.pad(eq_t, ((0, 0), (0, bp - batch)))

    slab_a, slab_bd, slab_k32, slab_k16, slab_d, bias = pack_params(
        pe, ce, dec, weight_dtype)

    y = pl.pallas_call(
        functools.partial(p2inn_kernel, act_dtype=act_dtype),
        out_shape=jax.ShapeDtypeStruct((1, bp), jnp.float32),
        grid_spec=pltpu.PrefetchScalarGridSpec(
            num_scalar_prefetch=0,
            grid=(bp // tb,),
            in_specs=[
                pl.BlockSpec((IN_ROWS, tb), lambda i: (0, i)),
                pl.BlockSpec(slab_a.shape, lambda i: (0, 0)),
                pl.BlockSpec(slab_bd.shape, lambda i: (0, 0)),
                pl.BlockSpec(slab_k32.shape, lambda i: (0, 0)),
                pl.BlockSpec(slab_k16.shape, lambda i: (0, 0)),
                pl.BlockSpec(slab_d.shape, lambda i: (0, 0)),
                pl.BlockSpec(bias.shape, lambda i: (0, 0)),
            ],
            out_specs=pl.BlockSpec((1, tb), lambda i: (0, i)),
        ),
        compiler_params=pltpu.CompilerParams(dimension_semantics=("parallel",)),
    )(eq_t, slab_a, slab_bd, slab_k32, slab_k16, slab_d, bias)

    return y[0, :batch].reshape(orig_shape)


# ----------------------------------------------------------------------------
# Pure-JAX reference replicating the PyTorch forward.
# ----------------------------------------------------------------------------
def p2inn_forward_ref(pe, ce, dec, t, m, mu, k, y0, v0):
    batch = math.prod(t.shape[:-1])
    flatten = lambda x: x.reshape(batch, -1).astype(jnp.float32)
    eq = jnp.concatenate(
        [flatten(m), flatten(mu), flatten(k), flatten(y0), flatten(v0)], axis=1)
    h_p = eq
    for w, b in pe:
        h_p = jnp.tanh(h_p @ w + b)
    h_c = flatten(t)
    for w, b in ce:
        h_c = jnp.tanh(h_c @ w + b)
    h = jnp.concatenate([h_p, h_c], axis=1)
    for w, b in dec[:-1]:
        h = jnp.tanh(h @ w + b)
    w, b = dec[-1]
    return (h @ w + b).reshape(t.shape)


if __name__ == "__main__":
    key = jax.random.PRNGKey(0)
    kp, kt, km, kmu, kk, ky, kv = jax.random.split(key, 7)

    pe, ce, dec = init_params(kp)

    def make_inputs(shape, kt, km, kmu, kk, ky, kv):
        t = jax.random.uniform(kt, shape, jnp.float32, 0.0, 1.0)
        m = jax.random.uniform(km, shape, jnp.float32, 0.5, 2.0)
        mu = jax.random.uniform(kmu, shape, jnp.float32, 0.0, 1.0)
        k = jax.random.uniform(kk, shape, jnp.float32, 0.5, 2.0)
        y0 = jax.random.uniform(ky, shape, jnp.float32, -1.0, 1.0)
        v0 = jax.random.uniform(kv, shape, jnp.float32, -1.0, 1.0)
        return t, m, mu, k, y0, v0

    # check 1: batch = 2*64 = 128 (single tile), f32 mode, strict tolerance
    shape = (2, 64, 1)
    inputs = make_inputs(shape, kt, km, kmu, kk, ky, kv)
    out = jax.block_until_ready(p2inn_forward(pe, ce, dec, *inputs))
    ref = p2inn_forward_ref(pe, ce, dec, *inputs)
    assert out.shape == shape, (out.shape, shape)
    assert jnp.allclose(out, ref, rtol=1e-3, atol=1e-3), "mismatch vs JAX reference"

    # check 2: batch = 300 -> multi-tile grid (2 steps) + batch padding, f32 mode
    shape2 = (3, 100, 1)
    k2 = jax.random.split(key, 13)[7:]
    inputs2 = make_inputs(shape2, *k2)
    out2 = jax.block_until_ready(p2inn_forward(pe, ce, dec, *inputs2))
    ref2 = p2inn_forward_ref(pe, ce, dec, *inputs2)
    assert out2.shape == shape2, (out2.shape, shape2)
    assert jnp.allclose(out2, ref2, rtol=1e-3, atol=1e-3), "mismatch (padded batch)"

    # check 3: exercise the bf16 fast paths (loose tolerance vs the f32 reference,
    # per review: bf16 weights/activations cannot meet 1e-3 deterministically).
    out_b = jax.block_until_ready(
        p2inn_forward(pe, ce, dec, *inputs, precision="bf16"))
    assert jnp.all(jnp.isfinite(out_b)), "non-finite bf16 output"
    assert jnp.allclose(out_b, ref, rtol=1e-1, atol=1e-1), "bf16 path diverged"

    out_m = jax.block_until_ready(
        p2inn_forward(pe, ce, dec, *inputs, precision="bf16_mxu"))
    assert jnp.all(jnp.isfinite(out_m)), "non-finite bf16_mxu output"
    assert jnp.allclose(out_m, ref, rtol=1e-1, atol=1e-1), "bf16_mxu path diverged"

    print("KERNEL_OK")
</pallas_src>

<mosaic_0001>
module attributes {stable_mosaic.version = 11 : i64} {
  func.func @p2inn_kernel(%arg0: i32, %arg1: memref<8x128xf32, #tpu.memory_space<vmem>>, %arg2: memref<48x8xf32, #tpu.memory_space<vmem>>, %arg3: memref<96x48xf32, #tpu.memory_space<vmem>>, %arg4: memref<96x32xf32, #tpu.memory_space<vmem>>, %arg5: memref<64x16xf32, #tpu.memory_space<vmem>>, %arg6: memref<328x64xf32, #tpu.memory_space<vmem>>, %arg7: memref<64x16xf32, #tpu.memory_space<vmem>>, %arg8: memref<1x128xf32, #tpu.memory_space<vmem>>) attributes {dimension_semantics = [#tpu.dimension_semantics<parallel>], iteration_bounds = array<i64: 1>, scalar_prefetch = 0 : i64, scratch_operands = 0 : i64, tpu.core_type = #tpu.core_type<tc>, window_params = [{transform_indices = @transform_0, window_bounds = array<i64: 8, 128>}, {pipeline_mode = #tpu.pipeline_mode<synchronous>, transform_indices = @transform_1, window_bounds = array<i64: 48, 8>}, {pipeline_mode = #tpu.pipeline_mode<synchronous>, transform_indices = @transform_2, window_bounds = array<i64: 96, 48>}, {pipeline_mode = #tpu.pipeline_mode<synchronous>, transform_indices = @transform_3, window_bounds = array<i64: 96, 32>}, {pipeline_mode = #tpu.pipeline_mode<synchronous>, transform_indices = @transform_4, window_bounds = array<i64: 64, 16>}, {pipeline_mode = #tpu.pipeline_mode<synchronous>, transform_indices = @transform_5, window_bounds = array<i64: 328, 64>}, {pipeline_mode = #tpu.pipeline_mode<synchronous>, transform_indices = @transform_6, window_bounds = array<i64: 64, 16>}, {transform_indices = @transform_7, window_bounds = array<i64: 1, 128>}]} {
    %c0 = arith.constant 0 : index
    %c0_0 = arith.constant 0 : index
    %0 = vector.load %arg1[%c0, %c0_0] : memref<8x128xf32, #tpu.memory_space<vmem>>, vector<8x128xf32>
    %c0_1 = arith.constant 0 : index
    %c0_2 = arith.constant 0 : index
    %1 = vector.load %arg7[%c0_1, %c0_2] : memref<64x16xf32, #tpu.memory_space<vmem>>, vector<64x16xf32>
    %c0_3 = arith.constant 0 : index
    %c0_4 = arith.constant 0 : index
    %2 = vector.load %arg2[%c0_3, %c0_4] : memref<48x8xf32, #tpu.memory_space<vmem>>, vector<48x8xf32>
    %cst = arith.constant dense<0.000000e+00> : vector<48x128xf32>
    %3 = tpu.matmul %2, %0, %cst {dimension_numbers = #tpu.dot_dimension_numbers<[1], [0], [0], [1], [0, 0, 1, 1], [], []>} : vector<48x8xf32>, vector<8x128xf32>, vector<48x128xf32> -> vector<48x128xf32>
    %4 = math.tanh %3 : vector<48x128xf32>
    %c0_5 = arith.constant 0 : index
    %c0_6 = arith.constant 0 : index
    %5 = vector.load %arg3[%c0_5, %c0_6] : memref<96x48xf32, #tpu.memory_space<vmem>>, vector<48x48xf32>
    %cst_7 = arith.constant dense<0.000000e+00> : vector<48x128xf32>
    %6 = tpu.matmul %5, %4, %cst_7 {dimension_numbers = #tpu.dot_dimension_numbers<[1], [0], [0], [1], [0, 0, 1, 1], [], []>} : vector<48x48xf32>, vector<48x128xf32>, vector<48x128xf32> -> vector<48x128xf32>
    %7 = vector.extract_strided_slice %1 {offsets = [0, 0], sizes = [48, 1], strides = [1, 1]} : vector<64x16xf32> to vector<48x1xf32>
    %8 = vector.broadcast %7 : vector<48x1xf32> to vector<48x128xf32>
    %9 = arith.addf %6, %8 : vector<48x128xf32>
    %10 = math.tanh %9 : vector<48x128xf32>
    %c48 = arith.constant 48 : index
    %c0_8 = arith.constant 0 : index
    %11 = vector.load %arg3[%c48, %c0_8] : memref<96x48xf32, #tpu.memory_space<vmem>>, vector<48x48xf32>
    %cst_9 = arith.constant dense<0.000000e+00> : vector<48x128xf32>
    %12 = tpu.matmul %11, %10, %cst_9 {dimension_numbers = #tpu.dot_dimension_numbers<[1], [0], [0], [1], [0, 0, 1, 1], [], []>} : vector<48x48xf32>, vector<48x128xf32>, vector<48x128xf32> -> vector<48x128xf32>
    %13 = vector.extract_strided_slice %1 {offsets = [0, 1], sizes = [48, 1], strides = [1, 1]} : vector<64x16xf32> to vector<48x1xf32>
    %14 = vector.broadcast %13 : vector<48x1xf32> to vector<48x128xf32>
    %15 = arith.addf %12, %14 : vector<48x128xf32>
    %16 = math.tanh %15 : vector<48x128xf32>
    %c0_10 = arith.constant 0 : index
    %c0_11 = arith.constant 0 : index
    %17 = vector.load %arg4[%c0_10, %c0_11] : memref<96x32xf32, #tpu.memory_space<vmem>>, vector<32x32xf32>
    %18 = vector.extract_strided_slice %16 {offsets = [0, 0], sizes = [32, 128], strides = [1, 1]} : vector<48x128xf32> to vector<32x128xf32>
    %cst_12 = arith.constant dense<0.000000e+00> : vector<32x128xf32>
    %19 = tpu.matmul %17, %18, %cst_12 {dimension_numbers = #tpu.dot_dimension_numbers<[1], [0], [0], [1], [0, 0, 1, 1], [], []>} : vector<32x32xf32>, vector<32x128xf32>, vector<32x128xf32> -> vector<32x128xf32>
    %20 = vector.extract_strided_slice %1 {offsets = [0, 2], sizes = [32, 1], strides = [1, 1]} : vector<64x16xf32> to vector<32x1xf32>
    %21 = vector.broadcast %20 : vector<32x1xf32> to vector<32x128xf32>
    %22 = arith.addf %19, %21 : vector<32x128xf32>
    %23 = math.tanh %22 : vector<32x128xf32>
    %24 = vector.extract_strided_slice %16 {offsets = [32, 0], sizes = [16, 128], strides = [1, 1]} : vector<48x128xf32> to vector<16x128xf32>
    %c32 = arith.constant 32 : index
    %c0_13 = arith.constant 0 : index
    %25 = vector.load %arg4[%c32, %c0_13] : memref<96x32xf32, #tpu.memory_space<vmem>>, vector<64x32xf32>
    %cst_14 = arith.constant dense<0.000000e+00> : vector<64x128xf32>
    %26 = tpu.matmul %25, %23, %cst_14 {dimension_numbers = #tpu.dot_dimension_numbers<[1], [0], [0], [1], [0, 0, 1, 1], [], []>} : vector<64x32xf32>, vector<32x128xf32>, vector<64x128xf32> -> vector<64x128xf32>
    %c0_15 = arith.constant 0 : index
    %c0_16 = arith.constant 0 : index
    %27 = vector.load %arg5[%c0_15, %c0_16] : memref<64x16xf32, #tpu.memory_space<vmem>>, vector<64x16xf32>
    %cst_17 = arith.constant dense<0.000000e+00> : vector<64x128xf32>
    %28 = tpu.matmul %27, %24, %cst_17 {dimension_numbers = #tpu.dot_dimension_numbers<[1], [0], [0], [1], [0, 0, 1, 1], [], []>} : vector<64x16xf32>, vector<16x128xf32>, vector<64x128xf32> -> vector<64x128xf32>
    %29 = arith.addf %26, %28 : vector<64x128xf32>
    %30 = vector.extract_strided_slice %1 {offsets = [0, 3], sizes = [64, 1], strides = [1, 1]} : vector<64x16xf32> to vector<64x1xf32>
    %31 = vector.broadcast %30 : vector<64x1xf32> to vector<64x128xf32>
    %32 = arith.addf %29, %31 : vector<64x128xf32>
    %33 = math.tanh %32 : vector<64x128xf32>
    %c0_18 = arith.constant 0 : index
    %c0_19 = arith.constant 0 : index
    %34 = vector.load %arg6[%c0_18, %c0_19] : memref<328x64xf32, #tpu.memory_space<vmem>>, vector<64x64xf32>
    %cst_20 = arith.constant dense<0.000000e+00> : vector<64x128xf32>
    %35 = tpu.matmul %34, %33, %cst_20 {dimension_numbers = #tpu.dot_dimension_numbers<[1], [0], [0], [1], [0, 0, 1, 1], [], []>} : vector<64x64xf32>, vector<64x128xf32>, vector<64x128xf32> -> vector<64x128xf32>
    %36 = vector.extract_strided_slice %1 {offsets = [0, 4], sizes = [64, 1], strides = [1, 1]} : vector<64x16xf32> to vector<64x1xf32>
    %37 = vector.broadcast %36 : vector<64x1xf32> to vector<64x128xf32>
    %38 = arith.addf %35, %37 : vector<64x128xf32>
    %39 = math.tanh %38 : vector<64x128xf32>
    %c64 = arith.constant 64 : index
    %c0_21 = arith.constant 0 : index
    %40 = vector.load %arg6[%c64, %c0_21] : memref<328x64xf32, #tpu.memory_space<vmem>>, vector<64x64xf32>
    %cst_22 = arith.constant dense<0.000000e+00> : vector<64x128xf32>
    %41 = tpu.matmul %40, %39, %cst_22 {dimension_numbers = #tpu.dot_dimension_numbers<[1], [0], [0], [1], [0, 0, 1, 1], [], []>} : vector<64x64xf32>, vector<64x128xf32>, vector<64x128xf32> -> vector<64x128xf32>
    %42 = vector.extract_strided_slice %1 {offsets = [0, 5], sizes = [64, 1], strides = [1, 1]} : vector<64x16xf32> to vector<64x1xf32>
    %43 = vector.broadcast %42 : vector<64x1xf32> to vector<64x128xf32>
    %44 = arith.addf %41, %43 : vector<64x128xf32>
    %45 = math.tanh %44 : vector<64x128xf32>
    %c128 = arith.constant 128 : index
    %c0_23 = arith.constant 0 : index
    %46 = vector.load %arg6[%c128, %c0_23] : memref<328x64xf32, #tpu.memory_space<vmem>>, vector<64x64xf32>
    %cst_24 = arith.constant dense<0.000000e+00> : vector<64x128xf32>
    %47 = tpu.matmul %46, %45, %cst_24 {dimension_numbers = #tpu.dot_dimension_numbers<[1], [0], [0], [1], [0, 0, 1, 1], [], []>} : vector<64x64xf32>, vector<64x128xf32>, vector<64x128xf32> -> vector<64x128xf32>
    %48 = vector.extract_strided_slice %1 {offsets = [0, 6], sizes = [64, 1], strides = [1, 1]} : vector<64x16xf32> to vector<64x1xf32>
    %49 = vector.broadcast %48 : vector<64x1xf32> to vector<64x128xf32>
    %50 = arith.addf %47, %49 : vector<64x128xf32>
    %51 = math.tanh %50 : vector<64x128xf32>
    %c192 = arith.constant 192 : index
    %c0_25 = arith.constant 0 : index
    %52 = vector.load %arg6[%c192, %c0_25] : memref<328x64xf32, #tpu.memory_space<vmem>>, vector<64x64xf32>
    %cst_26 = arith.constant dense<0.000000e+00> : vector<64x128xf32>
    %53 = tpu.matmul %52, %51, %cst_26 {dimension_numbers = #tpu.dot_dimension_numbers<[1], [0], [0], [1], [0, 0, 1, 1], [], []>} : vector<64x64xf32>, vector<64x128xf32>, vector<64x128xf32> -> vector<64x128xf32>
    %54 = vector.extract_strided_slice %1 {offsets = [0, 7], sizes = [64, 1], strides = [1, 1]} : vector<64x16xf32> to vector<64x1xf32>
    %55 = vector.broadcast %54 : vector<64x1xf32> to vector<64x128xf32>
    %56 = arith.addf %53, %55 : vector<64x128xf32>
    %57 = math.tanh %56 : vector<64x128xf32>
    %c256 = arith.constant 256 : index
    %c0_27 = arith.constant 0 : index
    %58 = vector.load %arg6[%c256, %c0_27] : memref<328x64xf32, #tpu.memory_space<vmem>>, vector<64x64xf32>
    %cst_28 = arith.constant dense<0.000000e+00> : vector<64x128xf32>
    %59 = tpu.matmul %58, %57, %cst_28 {dimension_numbers = #tpu.dot_dimension_numbers<[1], [0], [0], [1], [0, 0, 1, 1], [], []>} : vector<64x64xf32>, vector<64x128xf32>, vector<64x128xf32> -> vector<64x128xf32>
    %60 = vector.extract_strided_slice %1 {offsets = [0, 8], sizes = [64, 1], strides = [1, 1]} : vector<64x16xf32> to vector<64x1xf32>
    %61 = vector.broadcast %60 : vector<64x1xf32> to vector<64x128xf32>
    %62 = arith.addf %59, %61 : vector<64x128xf32>
    %63 = math.tanh %62 : vector<64x128xf32>
    %c320 = arith.constant 320 : index
    %c0_29 = arith.constant 0 : index
    %64 = vector.load %arg6[%c320, %c0_29] : memref<328x64xf32, #tpu.memory_space<vmem>>, vector<8x64xf32>
    %cst_30 = arith.constant dense<0.000000e+00> : vector<8x128xf32>
    %65 = tpu.matmul %64, %63, %cst_30 {dimension_numbers = #tpu.dot_dimension_numbers<[1], [0], [0], [1], [0, 0, 1, 1], [], []>} : vector<8x64xf32>, vector<64x128xf32>, vector<8x128xf32> -> vector<8x128xf32>
    %66 = vector.extract_strided_slice %65 {offsets = [0, 0], sizes = [1, 128], strides = [1, 1]} : vector<8x128xf32> to vector<1x128xf32>
    %67 = vector.extract_strided_slice %1 {offsets = [0, 9], sizes = [1, 1], strides = [1, 1]} : vector<64x16xf32> to vector<1x1xf32>
    %68 = vector.broadcast %67 : vector<1x1xf32> to vector<1x128xf32>
    %69 = arith.addf %66, %68 : vector<1x128xf32>
    %c0_31 = arith.constant 0 : index
    %c0_32 = arith.constant 0 : index
    %70 = vector.load %arg8[%c0_31, %c0_32] : memref<1x128xf32, #tpu.memory_space<vmem>>, vector<1x128xf32>
    tpu.vector_store %arg8[%c0_31, %c0_32], %69 {strides = array<i32>} : memref<1x128xf32, #tpu.memory_space<vmem>>, vector<1x128xf32>,
    return
  }
  func.func @transform_0(%arg0: i32) -> (i32, i32) {
    %c0_i32 = arith.constant 0 : i32
    %c0_i32_0 = arith.constant 0 : i32
    return %c0_i32, %arg0 : i32, i32
  }
  func.func @transform_1(%arg0: i32) -> (i32, i32) {
    %c0_i32 = arith.constant 0 : i32
    %c0_i32_0 = arith.constant 0 : i32
    %c0_i32_1 = arith.constant 0 : i32
    return %c0_i32, %c0_i32_0 : i32, i32
  }
  func.func @transform_2(%arg0: i32) -> (i32, i32) {
    %c0_i32 = arith.constant 0 : i32
    %c0_i32_0 = arith.constant 0 : i32
    %c0_i32_1 = arith.constant 0 : i32
    return %c0_i32, %c0_i32_0 : i32, i32
  }
  func.func @transform_3(%arg0: i32) -> (i32, i32) {
    %c0_i32 = arith.constant 0 : i32
    %c0_i32_0 = arith.constant 0 : i32
    %c0_i32_1 = arith.constant 0 : i32
    return %c0_i32, %c0_i32_0 : i32, i32
  }
  func.func @transform_4(%arg0: i32) -> (i32, i32) {
    %c0_i32 = arith.constant 0 : i32
    %c0_i32_0 = arith.constant 0 : i32
    %c0_i32_1 = arith.constant 0 : i32
    return %c0_i32, %c0_i32_0 : i32, i32
  }
  func.func @transform_5(%arg0: i32) -> (i32, i32) {
    %c0_i32 = arith.constant 0 : i32
    %c0_i32_0 = arith.constant 0 : i32
    %c0_i32_1 = arith.constant 0 : i32
    return %c0_i32, %c0_i32_0 : i32, i32
  }
  func.func @transform_6(%arg0: i32) -> (i32, i32) {
    %c0_i32 = arith.constant 0 : i32
    %c0_i32_0 = arith.constant 0 : i32
    %c0_i32_1 = arith.constant 0 : i32
    return %c0_i32, %c0_i32_0 : i32, i32
  }
  func.func @transform_7(%arg0: i32) -> (i32, i32) {
    %c0_i32 = arith.constant 0 : i32
    %c0_i32_0 = arith.constant 0 : i32
    return %c0_i32, %arg0 : i32, i32
  }
}

</mosaic_0001>

<bundles_post_ra>
// kernel: tpu_custom_call.1
= control target key start
LH: loop header
LB: loop body
LE: loop exit
PB: predicated region body
PF: predicated region fallthrough
CT: control target
= control target key end

     0   :  { %vm42_vm0 = vcmask 64512   ;;  %s3097_s0 = inlined_call_operand.vmem [shape: f32[8,128], index: 0, kind: input, shape index: {}]   ;;  %s3098_s1 = inlined_call_operand.vmem [shape: f32[48,8], index: 1, kind: input, shape index: {}]   ;;  %s3099_s2 = inlined_call_operand.vmem [shape: f32[96,48], index: 2, kind: input, shape index: {}]   ;;  %s3100_s3 = inlined_call_operand.vmem [shape: f32[96,32], index: 3, kind: input, shape index: {}]   ;;  %s3101_s4 = inlined_call_operand.vmem [shape: f32[64,16], index: 4, kind: input, shape index: {}]   ;;  %s3102_s5 = inlined_call_operand.vmem [shape: f32[328,64], index: 5, kind: input, shape index: {}]   ;;  %s3103_s6 = inlined_call_operand.vmem [shape: f32[64,16], index: 6, kind: input, shape index: {}]   ;;  %s3104_s7 = inlined_call_operand.hbm [shape: f32[1,128], index: 7, kind: output, shape index: {}]  }
   0x1   :  { %v27_v0 = vld [vmem:[%s3097_s0] sm:$0xff]  ;;  %v37_v2 = vld [vmem:[%s3098_s1 + $0x8] sm:$0xff]  ;;  %v38_v3 = vld [vmem:[%s3098_s1 + $0x10] sm:$0xff] }
   0x2   :  { %v36_v1 = vld [vmem:[%s3098_s1] sm:$0xff]  ;;  %2123 = vmatprep.subr.mxu1 %v27_v0 }
   0x3   :  { %2125 = vmatprep.mubr.msk.f32.mxu1 %vm42_vm0, %v36_v1  ;;  %2124 = vmatpush3.msra.mxu1 %v27_v0 }
   0x4   :  { %12 = vsyncpa [#allocation3], 0  ;;  %2126 = vmatmul.mubr.msk.f32.vlgmr.msra.gmra.mxu1 %vm42_vm0, %v37_v2  ;;  %v39_v4 = vld [vmem:[%s3098_s1 + $0x18] sm:$0xff]  ;;  %v40_v5 = vld [vmem:[%s3098_s1 + $0x20] sm:$0xff]  ;;  %vm198_vm1 = vcmask 392192   ;;  %v2589_v10 = vmov 0  }
   0x5   :  { %2128 = vmatprep.mubr.msk.f32.mxu1 %vm42_vm0, %v38_v3  ;;  %v41_v6 = vld [vmem:[%s3098_s1 + $0x28] sm:$0xff]  ;;  %v162_v7 = vld [vmem:[%s3099_s2] sm:$0xff]  ;;  %v2675_v9 = vld [vmem:[%s3103_s6 + $0x18] sm:$0xff]  ;;  %2398 = vset.pattern.permute.xlu0 %v2589_v10  ;;  %v2590_v33 = vmov 1   ;;  %vm487_vm2 = vcmask 261120   ;;  %v2591_v0 = vmov 2  }
   0x6   :  { %v2670_v8 = vld [vmem:[%s3103_s6 + $0x28] sm:$0xff]  ;;  %2399 = vset.pattern.permute.xlu1 %v2589_v10  ;;  %v2682_v11 = vld [vmem:[%s3103_s6 + $0x20] sm:$0xff]  ;;  %v2687_v12 = vld [vmem:[%s3103_s6 + $0x10] sm:$0xff]  ;;  %vm605_vm3 = vcmask 130048   ;;  %vm954_vm4 = vcmask 523264   ;;  %vm2599_vm5 = vmmov 0  }
   0x7   :  { %195 = vperm.xlu0 %2398, %v2670_v8   ;;  %185 = vperm.xlu1 %2399, %v2675_v9   ;;  %v2694_v13 = vld [vmem:[%s3103_s6 + $0x8] sm:$0xff]  ;;  %v2699_v14 = vld [vmem:[%s3103_s6] sm:$0xff]  ;;  %v164_v28 = vld [vmem:[%s3099_s2 + $0x10] sm:$0xff]  ;;  %s2601_s22 = smov [#allocation2]  }
   0x8   :  { %2129 = vmatmul.mubr.msk.f32.gmra.mxu1 %vm42_vm0, %v39_v4  ;;  %v163_v27 = vld [vmem:[%s3099_s2 + $0x8] sm:$0xff]  ;;  %v165_v29 = vld [vmem:[%s3099_s2 + $0x18] sm:$0xff]  ;;  %v166_v30 = vld [vmem:[%s3099_s2 + $0x20] sm:$0xff]  ;;  %s1886_s23 = sshll.u32 %s2601_s22, 4  ;;  %s1887_s23 = int_to_ptr.vmem [resolvable:$true] %s1886_s23 }
   0x9   :  { %2131 = vmatprep.mubr.msk.f32.mxu1 %vm42_vm0, %v40_v5  ;;  %v167_v31 = vld [vmem:[%s3099_s2 + $0x28] sm:$0xff]  ;;  %v318_v32 = vld [vmem:[%s3099_s2 + $0x30] sm:$0xff]  ;;  %v319_v58 = vld [vmem:[%s3099_s2 + $0x38] sm:$0xff]  ;;  %s2567_s24 = scalar_lea.vmem %s1887_s23, 16  ;;  %s2571_s25 = scalar_lea.vmem %s1887_s23, 32 }
   0xa   :  { %2167 = vmatprep.mubr.msk.f32.mxu0 %vm198_vm1, %v318_v32  ;;  %v320_v59 = vld [vmem:[%s3099_s2 + $0x40] sm:$0xff]  ;;  %v321_v60 = vld [vmem:[%s3099_s2 + $0x48] sm:$0xff]  ;;  %v322_v62 = vld [vmem:[%s3099_s2 + $0x50] sm:$0xff]  ;;  %p2568_p0 = scmp.ne.s32.totalorder %s1887_s23, %s2567_s24  ;;  %p2572_p1 = scmp.lt.s32.totalorder %s1887_s23, %s1887_s23 }
   0xb   :  { %190 = vperm.xlu0 %2398, %v2682_v11   ;;  %180 = vperm.xlu1 %2399, %v2687_v12   ;;  %v467_v61 = vld [vmem:[%s3100_s3] sm:$0xff]  ;;  %v323_v63 = vld [vmem:[%s3099_s2 + $0x58] sm:$0xff]  ;;  %p2573_p2 = scmp.lt.s32.totalorder %s2571_s25, %s2567_s24 }
   0xc   :  { %2132 = vmatmul.mubr.msk.f32.gmra.mxu1 %vm42_vm0, %v41_v6 }
   0xd   :  { %2146 = vmatprep.mubr.msk.f32.mxu1 %vm198_vm1, %v162_v7  ;;  %p2574_p3 = por %p2573_p2, %p2572_p1 }
   0xf   :  { %175 = vperm.xlu0 %2398, %v2694_v13   ;;  %170 = vperm.xlu1 %2399, %v2699_v14   ;;  %p2575_p4 = pnand %p2574_p3, %p2568_p0 }
  0x13   :  { %2401 = vset.pattern.permute.xlu1 %v2590_v33  ;;  %2400 = vset.pattern.permute.xlu0 %v2590_v33 }
  0x14   :  { %333 = vperm.xlu1 %2401, %v2687_v12   ;;  %337 = vperm.xlu0 %2400, %v2675_v9  }
  0x18   :  { %329 = vperm.xlu1 %2401, %v2694_v13   ;;  %325 = vperm.xlu0 %2400, %v2699_v14  }
  0x1c   :  { %2402 = vset.pattern.permute.xlu1 %v2591_v0  ;;  %2403 = vset.pattern.permute.xlu0 %v2591_v0 }
  0x1d   :  { %484 = vperm.xlu1 %2402, %v2675_v9   ;;  %480 = vperm.xlu0 %2403, %v2687_v12  }
  0x21   :  { %2404 = vset.pattern.permute.xlu1 %v2590_v33  ;;  %2406 = vset.pattern.permute.xlu0 %v2590_v33 }
  0x22   :  { %345 = vperm.xlu1 %2404, %v2670_v8   ;;  %341 = vperm.xlu0 %2406, %v2682_v11  }
  0x26   :  { %2405 = vset.pattern.permute.xlu1 %v2591_v0  ;;  %v592_v0 = vld [vmem:[%s3100_s3 + $0x38] sm:$0xff] }
  0x27   :  { %476 = vperm.xlu1 %2405, %v2694_v13  }
  0x2b   :  { %472 = vperm.xlu1 %2405, %v2699_v14  }
  0x82   :  { %v196_v34 = vpop.permute.xlu0 %195  ;;  %v186_v36 = vpop.permute.xlu1 %185 }
  0x86   :  { %v191_v39 = vpop.permute.xlu0 %190  ;;  %v181_v41 = vpop.permute.xlu1 %180 }
  0x8a   :  { %v176_v47 = vpop.permute.xlu0 %175  ;;  %v171_v49 = vpop.permute.xlu1 %170 }
  0x8f   :  { %v334_v1 = vpop.permute.xlu1 %333  ;;  %v338_v2 = vpop.permute.xlu0 %337 }
  0x93   :  { %v330_v5 = vpop.permute.xlu1 %329  ;;  %v326_v10 = vpop.permute.xlu0 %325 }
  0xc4   :  { %v2127_v15 = vpop.f32.mrf.mxu1 }
  0xc6   :  { %v127_v16 = vpop.f32.mrf.mxu1 }
  0xc8   :  { %v2130_v17 = vpop.f32.mrf.mxu1 }
  0xca   :  { %v137_v18 = vpop.f32.mrf.mxu1 }
  0xcc   :  { %v2133_v19 = vpop.f32.mrf.mxu1 }
  0xcd   :  { %2421 = vtanh.f32 %v2133_v19 }
  0xce   :  { %v147_v20 = vpop.f32.mrf.mxu1 }
  0xcf   :  { %2423 = vtanh.f32 %v147_v20 }
  0xd0   :  { %2425 = vtanh.f32 %v2130_v17 }
  0xd1   :  { %2427 = vtanh.f32 %v137_v18 }
  0xd2   :  { %2429 = vtanh.f32 %v2127_v15 }
  0xd3   :  { %2431 = vtanh.f32 %v127_v16 }
  0xda   :  { %v2422_v21 = vpop.eup %2421 }
  0xdb   :  { %2134 = vmatprep.subr.mxu1 %v2422_v21 }
  0xdc   :  { %v2424_v22 = vpop.eup %2423  ;;  %2135 = vmatpush3.msra.mxu1 %v2422_v21 }
  0xdd   :  { %2136 = vmatprep.subr.mxu1 %v2424_v22  ;;  %v2426_v23 = vpop.eup %2425 }
  0xde   :  { %2137 = vmatpush3.msra.mxu1 %v2424_v22  ;;  %v2428_v24 = vpop.eup %2427 }
  0xdf   :  { %2138 = vmatprep.subr.mxu1 %v2426_v23  ;;  %v2430_v25 = vpop.eup %2429 }
  0xe0   :  { %2139 = vmatpush3.msra.mxu1 %v2426_v23  ;;  %v2432_v26 = vpop.eup %2431  ;;  %v468_v23 = vld [vmem:[%s3100_s3 + $0x8] sm:$0xff] }
  0xe1   :  { %2140 = vmatprep.subr.mxu1 %v2428_v24 }
  0xe2   :  { %2141 = vmatpush3.msra.mxu1 %v2428_v24  ;;  %v469_v24 = vld [vmem:[%s3100_s3 + $0x10] sm:$0xff] }
  0xe3   :  { %2142 = vmatprep.subr.mxu1 %v2430_v25 }
  0xe4   :  { %2143 = vmatpush3.msra.mxu1 %v2430_v25  ;;  %v470_v25 = vld [vmem:[%s3100_s3 + $0x18] sm:$0xff] }
  0xe5   :  { %2144 = vmatprep.subr.mxu1 %v2432_v26 }
  0xe6   :  { %2145 = vmatpush3.msra.mxu1 %v2432_v26  ;;  %v485_v26 = vpop.permute.xlu1 %484 }
  0xe7   :  { %2147 = vmatmul.mubr.msk.f32.vlgmr.msra.gmra.mxu1 %vm198_vm1, %v163_v27  ;;  %v481_v27 = vpop.permute.xlu0 %480 }
  0xe8   :  { %2149 = vmatprep.mubr.msk.f32.mxu1 %vm198_vm1, %v164_v28 }
  0xea   :  { %v346_v28 = vpop.permute.xlu1 %345 }
  0xeb   :  { %2150 = vmatmul.mubr.msk.f32.gmra.mxu1 %vm198_vm1, %v165_v29 }
  0xec   :  { %2152 = vmatprep.mubr.msk.f32.mxu1 %vm198_vm1, %v166_v30 }
  0xef   :  { %2153 = vmatmul.mubr.msk.f32.gmra.mxu1 %vm198_vm1, %v167_v31  ;;  %v342_v31 = vpop.permute.xlu0 %341 }
  0xf0   :  { %2184 = vmatprep.mubr.msk.f32.mxu1 %vm487_vm2, %v467_v61 }
 0x1a7   :  { %v2148_v35 = vpop.f32.mrf.mxu1 }
 0x1a8   :  { %v289_v50 = vadd.f32 %v2148_v35, %v176_v47  ;;  %v2592_v47 = vmov 3  }
 0x1a9   :  { %v283_v37 = vpop.f32.mrf.mxu1  ;;  %2407 = vset.pattern.permute.xlu1 %v2592_v47  ;;  %2408 = vset.pattern.permute.xlu0 %v2592_v47 }
 0x1aa   :  { %v284_v51 = vadd.f32 %v283_v37, %v171_v49  ;;  %v598_v37 = vld [vmem:[%s3101_s4 + $0x8] sm:$0xff] }
 0x1ab   :  { %v2151_v38 = vpop.f32.mrf.mxu1 }
 0x1ac   :  { %v299_v45 = vadd.f32 %v2151_v38, %v186_v36  ;;  %v597_v36 = vld [vmem:[%s3101_s4] sm:$0xff] }
 0x1ad   :  { %v293_v40 = vpop.f32.mrf.mxu1  ;;  %v589_v38 = vld [vmem:[%s3100_s3 + $0x20] sm:$0xff] }
 0x1ae   :  { %v294_v48 = vadd.f32 %v293_v40, %v181_v41  ;;  %v600_v40 = vld [vmem:[%s3101_s4 + $0x18] sm:$0xff]  ;;  %v601_v41 = vld [vmem:[%s3101_s4 + $0x20] sm:$0xff] }
 0x1af   :  { %v2154_v42 = vpop.f32.mrf.mxu1 }
 0x1b0   :  { %v309_v43 = vadd.f32 %v2154_v42, %v196_v34  ;;  %v602_v42 = vld [vmem:[%s3101_s4 + $0x28] sm:$0xff] }
 0x1b1   :  { %v303_v44 = vpop.f32.mrf.mxu1 }
 0x1b2   :  { %2433 = vtanh.f32 %v309_v43  ;;  %v304_v46 = vadd.f32 %v303_v44, %v191_v39  ;;  %v599_v39 = vld [vmem:[%s3101_s4 + $0x10] sm:$0xff]  ;;  %v604_v44 = vld [vmem:[%s3101_s4 + $0x38] sm:$0xff] }
 0x1b3   :  { %v603_v43 = vld [vmem:[%s3101_s4 + $0x30] sm:$0xff] }
 0x1b4   :  { %2435 = vtanh.f32 %v304_v46  ;;  %v2821_v46 = vld [vmem:[%s3103_s6 + $0x30] sm:$0xff] }
 0x1b5   :  { %2437 = vtanh.f32 %v299_v45  ;;  %v2816_v45 = vld [vmem:[%s3103_s6 + $0x38] sm:$0xff]  ;;  %890 = vperm.xlu0 %2408, %v2821_v46  }
 0x1b6   :  { %2439 = vtanh.f32 %v294_v48  ;;  %895 = vperm.xlu1 %2407, %v2816_v45   ;;  %v477_v48 = vpop.permute.xlu1 %476 }
 0x1b7   :  { %2441 = vtanh.f32 %v289_v50 }
 0x1b8   :  { %2443 = vtanh.f32 %v284_v51 }
 0x1b9   :  { %877 = vperm.xlu0 %2408, %v2675_v9  }
 0x1ba   :  { %885 = vperm.xlu1 %2407, %v2670_v8  }
 0x1bd   :  { %869 = vperm.xlu0 %2408, %v2694_v13  }
 0x1be   :  { %881 = vperm.xlu1 %2407, %v2682_v11  }
 0x1bf   :  { %v2434_v52 = vpop.eup %2433 }
 0x1c0   :  { %2155 = vmatprep.subr.mxu0 %v2434_v52 }
 0x1c1   :  { %v2436_v53 = vpop.eup %2435  ;;  %2156 = vmatpush3.msra.mxu0 %v2434_v52 }
 0x1c2   :  { %2157 = vmatprep.subr.mxu0 %v2436_v53  ;;  %v2438_v54 = vpop.eup %2437  ;;  %873 = vperm.xlu1 %2407, %v2687_v12  }
 0x1c3   :  { %2158 = vmatpush3.msra.mxu0 %v2436_v53  ;;  %v2440_v55 = vpop.eup %2439  ;;  %v473_v53 = vpop.permute.xlu1 %472 }
 0x1c4   :  { %2159 = vmatprep.subr.mxu0 %v2438_v54  ;;  %v2442_v56 = vpop.eup %2441 }
 0x1c5   :  { %2160 = vmatpush3.msra.mxu0 %v2438_v54  ;;  %v2444_v57 = vpop.eup %2443 }
 0x1c6   :  { %2161 = vmatprep.subr.mxu0 %v2440_v55  ;;  %865 = vperm.xlu1 %2407, %v2699_v14  }
 0x1c7   :  { %2162 = vmatpush3.msra.mxu0 %v2440_v55 }
 0x1c8   :  { %2163 = vmatprep.subr.mxu0 %v2442_v56 }
 0x1c9   :  { %2164 = vmatpush3.msra.mxu0 %v2442_v56 }
 0x1ca   :  { %2165 = vmatprep.subr.mxu0 %v2444_v57 }
 0x1cb   :  { %2166 = vmatpush3.msra.mxu0 %v2444_v57 }
 0x1cc   :  { %2168 = vmatmul.mubr.msk.f32.vlgmr.msra.gmra.mxu0 %vm198_vm1, %v319_v58 }
 0x1cd   :  { %2170 = vmatprep.mubr.msk.f32.mxu0 %vm198_vm1, %v320_v59 }
 0x1d0   :  { %2171 = vmatmul.mubr.msk.f32.gmra.mxu0 %vm198_vm1, %v321_v60 }
 0x1d1   :  { %2173 = vmatprep.mubr.msk.f32.mxu0 %vm198_vm1, %v322_v62  ;;  %v590_v62 = vld [vmem:[%s3100_s3 + $0x28] sm:$0xff] }
 0x1d4   :  { %2174 = vmatmul.mubr.msk.f32.gmra.mxu0 %vm198_vm1, %v323_v63  ;;  %v591_v63 = vld [vmem:[%s3100_s3 + $0x30] sm:$0xff] }
 0x1d5   :  { %2194 = vmatprep.mubr.msk.f32.mxu0 %vm605_vm3, %v597_v36 }
 0x28c   :  { %v2169_v3 = vpop.f32.mrf.mxu0 }
 0x28d   :  { %v438_v16 = vadd.f32 %v2169_v3, %v330_v5  ;;  %v595_v3 = vld [vmem:[%s3100_s3 + $0x50] sm:$0xff]  ;;  %v914_v5 = vld [vmem:[%s3102_s5] sm:$0xff] }
 0x28e   :  { %v432_v4 = vpop.f32.mrf.mxu0 }
 0x28f   :  { %v433_v18 = vadd.f32 %v432_v4, %v326_v10  ;;  %v596_v4 = vld [vmem:[%s3100_s3 + $0x58] sm:$0xff] }
 0x290   :  { %v2172_v6 = vpop.f32.mrf.mxu0 }
 0x291   :  { %v448_v7 = vadd.f32 %v2172_v6, %v338_v2  ;;  %v594_v2 = vld [vmem:[%s3100_s3 + $0x48] sm:$0xff]  ;;  %v2593_v6 = vmov 4  }
 0x292   :  { %v442_v15 = vpop.f32.mrf.mxu0  ;;  %2409 = vset.pattern.permute.xlu0 %v2593_v6  ;;  %2410 = vset.pattern.permute.xlu1 %v2593_v6  ;;  %v1092_v6 = vld [vmem:[%s3102_s5 + $0x40] sm:$0xff] }
 0x293   :  { %2445 = vtanh.f32 %v448_v7  ;;  %v443_v17 = vadd.f32 %v442_v15, %v334_v1  ;;  %v593_v1 = vld [vmem:[%s3100_s3 + $0x40] sm:$0xff]  ;;  %951 = vperm.xlu0 %2409, %v2816_v45   ;;  %947 = vperm.xlu1 %2410, %v2821_v46  }
 0x294   :  { %v2175_v29 = vpop.f32.mrf.mxu0 }
 0x295   :  { %2447 = vtanh.f32 %v443_v17  ;;  %v458_v30 = vadd.f32 %v2175_v29, %v346_v28  ;;  %v896_v17 = vpop.permute.xlu1 %895 }
 0x296   :  { %2449 = vtanh.f32 %v438_v16  ;;  %v452_v32 = vpop.f32.mrf.mxu0 }
 0x297   :  { %2451 = vtanh.f32 %v433_v18  ;;  %v453_v33 = vadd.f32 %v452_v32, %v342_v31  ;;  %939 = vperm.xlu0 %2409, %v2682_v11   ;;  %943 = vperm.xlu1 %2410, %v2670_v8  }
 0x298   :  { %2453 = vtanh.f32 %v458_v30 }
 0x299   :  { %2455 = vtanh.f32 %v453_v33 }
 0x29b   :  { %931 = vperm.xlu0 %2409, %v2687_v12   ;;  %935 = vperm.xlu1 %2410, %v2675_v9  }
 0x29f   :  { %923 = vperm.xlu0 %2409, %v2699_v14   ;;  %927 = vperm.xlu1 %2410, %v2694_v13  }
 0x2a0   :  { %v2446_v19 = vpop.eup %2445 }
 0x2a1   :  { %2176 = vmatprep.subr.mxu1 %v2446_v19 }
 0x2a2   :  { %v2448_v20 = vpop.eup %2447  ;;  %2177 = vmatpush3.msra.mxu1 %v2446_v19 }
 0x2a3   :  { %2178 = vmatprep.subr.mxu1 %v2448_v20  ;;  %v2450_v21 = vpop.eup %2449 }
 0x2a4   :  { %2179 = vmatpush3.msra.mxu1 %v2448_v20  ;;  %v2452_v22 = vpop.eup %2451 }
 0x2a5   :  { %2180 = vmatprep.subr.mxu1 %v2450_v21  ;;  %v2454_v34 = vpop.eup %2453 }
 0x2a6   :  { %2181 = vmatpush3.msra.mxu1 %v2450_v21  ;;  %2190 = vmatprep.subr.mxu0 %v2454_v34  ;;  %v2456_v35 = vpop.eup %2455 }
 0x2a7   :  { %2182 = vmatprep.subr.mxu1 %v2452_v22  ;;  %2191 = vmatpush3.msra.mxu0 %v2454_v34 }
 0x2a8   :  { %2183 = vmatpush3.msra.mxu1 %v2452_v22  ;;  %2192 = vmatprep.subr.mxu0 %v2456_v35  ;;  %v886_v22 = vpop.permute.xlu1 %885 }
 0x2a9   :  { %2185 = vmatmul.mubr.msk.f32.vlgmr.msra.gmra.mxu1 %vm487_vm2, %v468_v23  ;;  %2193 = vmatpush3.msra.mxu0 %v2456_v35 }
 0x2aa   :  { %2187 = vmatprep.mubr.msk.f32.mxu1 %vm487_vm2, %v469_v24  ;;  %2195 = vmatmul.mubr.msk.f32.vlgmr.msra.gmra.mxu0 %vm605_vm3, %v598_v37 }
 0x2ab   :  { %2197 = vmatprep.mubr.msk.f32.mxu0 %vm605_vm3, %v599_v39 }
 0x2ac   :  { %v882_v29 = vpop.permute.xlu1 %881 }
 0x2ad   :  { %2188 = vmatmul.mubr.msk.f32.gmra.mxu1 %vm487_vm2, %v470_v25 }
 0x2ae   :  { %2214 = vmatprep.mubr.msk.f32.mxu1 %vm487_vm2, %v589_v38  ;;  %2198 = vmatmul.mubr.msk.f32.gmra.mxu0 %vm605_vm3, %v600_v40 }
 0x2af   :  { %2200 = vmatprep.mubr.msk.f32.mxu0 %vm605_vm3, %v601_v41 }
 0x2b2   :  { %2201 = vmatmul.mubr.msk.f32.gmra.mxu0 %vm605_vm3, %v602_v42  ;;  %v874_v42 = vpop.permute.xlu1 %873 }
 0x2b3   :  { %2203 = vmatprep.mubr.msk.f32.mxu0 %vm605_vm3, %v603_v43 }
 0x2b6   :  { %2204 = vmatmul.mubr.msk.f32.gmra.mxu0 %vm605_vm3, %v604_v44 }
 0x2b7   :  { %2242 = vmatprep.mubr.msk.f32.mxu0 %vm954_vm4, %v914_v5  ;;  %v921_v5 = vld [vmem:[%s3102_s5 + $0x38] sm:$0xff] }
 0x369   :  { %v2186_v49 = vpop.f32.mrf.mxu1 }
 0x36a   :  { %v572_v55 = vadd.f32 %v2186_v49, %v477_v48  ;;  %v2196_v7 = vpop.f32.mrf.mxu0 }
 0x36b   :  { %v566_v50 = vpop.f32.mrf.mxu1 }
 0x36c   :  { %v567_v57 = vadd.f32 %v566_v50, %v473_v53  ;;  %v696_v10 = vpop.f32.mrf.mxu0 }
 0x36d   :  { %v2189_v51 = vpop.f32.mrf.mxu1 }
 0x36e   :  { %v582_v52 = vadd.f32 %v2189_v51, %v485_v26  ;;  %v2199_v15 = vpop.f32.mrf.mxu0  ;;  %v891_v26 = vpop.permute.xlu0 %890 }
 0x36f   :  { %v576_v54 = vpop.f32.mrf.mxu1 }
 0x370   :  { %2457 = vtanh.f32 %v582_v52  ;;  %v577_v56 = vadd.f32 %v576_v54, %v481_v27  ;;  %v706_v16 = vpop.f32.mrf.mxu0  ;;  %v866_v52 = vpop.permute.xlu1 %865 }
 0x372   :  { %2459 = vtanh.f32 %v577_v56  ;;  %v2202_v20 = vpop.f32.mrf.mxu0  ;;  %v878_v38 = vpop.permute.xlu0 %877 }
 0x373   :  { %2461 = vtanh.f32 %v572_v55 }
 0x374   :  { %2463 = vtanh.f32 %v567_v57  ;;  %v716_v24 = vpop.f32.mrf.mxu0 }
 0x376   :  { %v2205_v28 = vpop.f32.mrf.mxu0  ;;  %v870_v49 = vpop.permute.xlu0 %869 }
 0x378   :  { %v726_v33 = vpop.f32.mrf.mxu0 }
 0x37d   :  { %v2458_v58 = vpop.eup %2457 }
 0x37e   :  { %2206 = vmatprep.subr.mxu1 %v2458_v58 }
 0x37f   :  { %v2460_v59 = vpop.eup %2459  ;;  %2207 = vmatpush3.msra.mxu1 %v2458_v58 }
 0x380   :  { %2208 = vmatprep.subr.mxu1 %v2460_v59  ;;  %v2462_v60 = vpop.eup %2461 }
 0x381   :  { %2209 = vmatpush3.msra.mxu1 %v2460_v59  ;;  %v2464_v61 = vpop.eup %2463 }
 0x382   :  { %2210 = vmatprep.subr.mxu1 %v2462_v60 }
 0x383   :  { %2211 = vmatpush3.msra.mxu1 %v2462_v60 }
 0x384   :  { %2212 = vmatprep.subr.mxu1 %v2464_v61 }
 0x385   :  { %2213 = vmatpush3.msra.mxu1 %v2464_v61 }
 0x386   :  { %2215 = vmatmul.mubr.msk.f32.vlgmr.msra.gmra.mxu1 %vm487_vm2, %v590_v62 }
 0x387   :  { %2217 = vmatprep.mubr.msk.f32.mxu1 %vm487_vm2, %v591_v63  ;;  %v915_v63 = vld [vmem:[%s3102_s5 + $0x8] sm:$0xff] }
 0x38a   :  { %2218 = vmatmul.mubr.msk.f32.gmra.mxu1 %vm487_vm2, %v592_v0  ;;  %v916_v0 = vld [vmem:[%s3102_s5 + $0x10] sm:$0xff] }
 0x38b   :  { %2220 = vmatprep.mubr.msk.f32.mxu1 %vm487_vm2, %v593_v1  ;;  %v917_v1 = vld [vmem:[%s3102_s5 + $0x18] sm:$0xff] }
 0x38e   :  { %2221 = vmatmul.mubr.msk.f32.gmra.mxu1 %vm487_vm2, %v594_v2  ;;  %v918_v2 = vld [vmem:[%s3102_s5 + $0x20] sm:$0xff] }
 0x38f   :  { %2223 = vmatprep.mubr.msk.f32.mxu1 %vm487_vm2, %v595_v3  ;;  %v919_v3 = vld [vmem:[%s3102_s5 + $0x28] sm:$0xff] }
 0x392   :  { %2224 = vmatmul.mubr.msk.f32.gmra.mxu1 %vm487_vm2, %v596_v4  ;;  %v920_v4 = vld [vmem:[%s3102_s5 + $0x30] sm:$0xff] }
 0x393   :  { %2270 = vmatprep.mubr.msk.f32.mxu1 %vm954_vm4, %v1092_v6 }
 0x446   :  { %v2216_v18 = vpop.f32.mrf.mxu1 }
 0x447   :  { %v831_v47 = vadd.f32 %v2216_v18, %v2196_v7  ;;  %v2594_v7 = vmov 5  }
 0x448   :  { %v825_v19 = vpop.f32.mrf.mxu1  ;;  %2411 = vset.pattern.permute.xlu1 %v2594_v7  ;;  %2412 = vset.pattern.permute.xlu0 %v2594_v7 }
 0x449   :  { %v826_v50 = vadd.f32 %v825_v19, %v696_v10  ;;  %v899_v53 = vadd.f32 %v870_v49, %v831_v47  ;;  %1129 = vperm.xlu1 %2411, %v2816_v45   ;;  %1125 = vperm.xlu0 %2412, %v2821_v46   ;;  %v1094_v49 = vld [vmem:[%s3102_s5 + $0x50] sm:$0xff] }
 0x44a   :  { %v2219_v21 = vpop.f32.mrf.mxu1 }
 0x44b   :  { %v841_v39 = vadd.f32 %v2219_v21, %v2199_v15  ;;  %v898_v54 = vadd.f32 %v866_v52, %v826_v50  ;;  %v948_v15 = vpop.permute.xlu1 %947  ;;  %v1095_v50 = vld [vmem:[%s3102_s5 + $0x58] sm:$0xff]  ;;  %v1097_v52 = vld [vmem:[%s3102_s5 + $0x68] sm:$0xff] }
 0x44c   :  { %v835_v23 = vpop.f32.mrf.mxu1 }
 0x44d   :  { %v836_v43 = vadd.f32 %v835_v23, %v706_v16  ;;  %v901_v48 = vadd.f32 %v878_v38, %v841_v39  ;;  %1121 = vperm.xlu1 %2411, %v2670_v8   ;;  %1113 = vperm.xlu0 %2412, %v2675_v9  }
 0x44e   :  { %v2222_v25 = vpop.f32.mrf.mxu1 }
 0x44f   :  { %v851_v31 = vadd.f32 %v2222_v25, %v2202_v20  ;;  %v900_v51 = vadd.f32 %v874_v42, %v836_v43  ;;  %v944_v20 = vpop.permute.xlu1 %943 }
 0x450   :  { %v845_v27 = vpop.f32.mrf.mxu1 }
 0x451   :  { %v846_v35 = vadd.f32 %v845_v27, %v716_v24  ;;  %v903_v40 = vadd.f32 %v886_v22, %v851_v31  ;;  %1117 = vperm.xlu1 %2411, %v2682_v11   ;;  %1105 = vperm.xlu0 %2412, %v2694_v13  }
 0x452   :  { %v2225_v30 = vpop.f32.mrf.mxu1 }
 0x453   :  { %v861_v32 = vadd.f32 %v2225_v30, %v2205_v28  ;;  %v902_v44 = vadd.f32 %v882_v29, %v846_v35 }
 0x454   :  { %v855_v34 = vpop.f32.mrf.mxu1 }
 0x455   :  { %v905_v36 = vadd.f32 %v896_v17, %v861_v32  ;;  %v856_v37 = vadd.f32 %v855_v34, %v726_v33  ;;  %1109 = vperm.xlu1 %2411, %v2687_v12   ;;  %v952_v17 = vpop.permute.xlu0 %951 }
 0x457   :  { %2465 = vtanh.f32 %v905_v36  ;;  %v904_v41 = vadd.f32 %v891_v26, %v856_v37  ;;  %v936_v26 = vpop.permute.xlu1 %935 }
 0x459   :  { %2467 = vtanh.f32 %v904_v41  ;;  %1101 = vperm.xlu1 %2411, %v2699_v14   ;;  %v940_v22 = vpop.permute.xlu0 %939 }
 0x45a   :  { %2469 = vtanh.f32 %v903_v40 }
 0x45b   :  { %2471 = vtanh.f32 %v902_v44  ;;  %v928_v33 = vpop.permute.xlu1 %927 }
 0x45c   :  { %2473 = vtanh.f32 %v901_v48  ;;  %v1093_v48 = vld [vmem:[%s3102_s5 + $0x48] sm:$0xff] }
 0x45d   :  { %2475 = vtanh.f32 %v900_v51  ;;  %v932_v30 = vpop.permute.xlu0 %931  ;;  %v1096_v51 = vld [vmem:[%s3102_s5 + $0x60] sm:$0xff] }
 0x45e   :  { %2477 = vtanh.f32 %v899_v53  ;;  %v1098_v53 = vld [vmem:[%s3102_s5 + $0x70] sm:$0xff] }
 0x45f   :  { %2479 = vtanh.f32 %v898_v54  ;;  %v1099_v54 = vld [vmem:[%s3102_s5 + $0x78] sm:$0xff] }
 0x461   :  { %v924_v35 = vpop.permute.xlu0 %923 }
 0x464   :  { %v2466_v55 = vpop.eup %2465 }
 0x465   :  { %2226 = vmatprep.subr.mxu0 %v2466_v55 }
 0x466   :  { %v2468_v56 = vpop.eup %2467  ;;  %2227 = vmatpush3.msra.mxu0 %v2466_v55  ;;  %v1269_v55 = vld [vmem:[%s3102_s5 + $0x80] sm:$0xff] }
 0x467   :  { %2228 = vmatprep.subr.mxu0 %v2468_v56  ;;  %v2470_v57 = vpop.eup %2469 }
 0x468   :  { %2229 = vmatpush3.msra.mxu0 %v2468_v56  ;;  %v2472_v58 = vpop.eup %2471  ;;  %v2595_v56 = vmov 6  }
 0x469   :  { %2230 = vmatprep.subr.mxu0 %v2470_v57  ;;  %v2474_v59 = vpop.eup %2473  ;;  %2413 = vset.pattern.permute.xlu0 %v2595_v56 }
 0x46a   :  { %2231 = vmatpush3.msra.mxu0 %v2470_v57  ;;  %v2476_v60 = vpop.eup %2475  ;;  %2414 = vset.pattern.permute.xlu1 %v2595_v56 }
 0x46b   :  { %2232 = vmatprep.subr.mxu0 %v2472_v58  ;;  %v2478_v61 = vpop.eup %2477  ;;  %1306 = vperm.xlu0 %2413, %v2816_v45  }
 0x46c   :  { %2233 = vmatpush3.msra.mxu0 %v2472_v58  ;;  %v2480_v62 = vpop.eup %2479  ;;  %1302 = vperm.xlu1 %2414, %v2821_v46  }
 0x46d   :  { %2234 = vmatprep.subr.mxu0 %v2474_v59 }
 0x46e   :  { %2235 = vmatpush3.msra.mxu0 %v2474_v59 }
 0x46f   :  { %2236 = vmatprep.subr.mxu0 %v2476_v60  ;;  %1294 = vperm.xlu0 %2413, %v2682_v11  }
 0x470   :  { %2237 = vmatpush3.msra.mxu0 %v2476_v60  ;;  %1298 = vperm.xlu1 %2414, %v2670_v8  }
 0x471   :  { %2238 = vmatprep.subr.mxu0 %v2478_v61 }
 0x472   :  { %2239 = vmatpush3.msra.mxu0 %v2478_v61 }
 0x473   :  { %2240 = vmatprep.subr.mxu0 %v2480_v62  ;;  %1286 = vperm.xlu0 %2413, %v2687_v12  }
 0x474   :  { %2241 = vmatpush3.msra.mxu0 %v2480_v62  ;;  %1290 = vperm.xlu1 %2414, %v2675_v9  }
 0x475   :  { %2243 = vmatmul.mubr.msk.f32.vlgmr.msra.gmra.mxu0 %vm954_vm4, %v915_v63 }
 0x476   :  { %2245 = vmatprep.mubr.msk.f32.mxu0 %vm954_vm4, %v916_v0 }
 0x477   :  { %1278 = vperm.xlu0 %2413, %v2699_v14  }
 0x478   :  { %1282 = vperm.xlu1 %2414, %v2694_v13  }
 0x479   :  { %2246 = vmatmul.mubr.msk.f32.gmra.mxu0 %vm954_vm4, %v917_v1 }
 0x47a   :  { %2248 = vmatprep.mubr.msk.f32.mxu0 %vm954_vm4, %v918_v2 }
 0x47d   :  { %2249 = vmatmul.mubr.msk.f32.gmra.mxu0 %vm954_vm4, %v919_v3 }
 0x47e   :  { %2251 = vmatprep.mubr.msk.f32.mxu0 %vm954_vm4, %v920_v4 }
 0x481   :  { %2252 = vmatmul.mubr.msk.f32.gmra.mxu0 %vm954_vm4, %v921_v5 }
 0x482   :  { %2298 = vmatprep.mubr.msk.f32.mxu0 %vm954_vm4, %v1269_v55 }
 0x4c4   :  { %v1130_v57 = vpop.permute.xlu1 %1129  ;;  %v1126_v63 = vpop.permute.xlu0 %1125 }
 0x4c8   :  { %v1122_v60 = vpop.permute.xlu1 %1121  ;;  %v1114_v3 = vpop.permute.xlu0 %1113 }
 0x4cc   :  { %v1118_v1 = vpop.permute.xlu1 %1117  ;;  %v1106_v6 = vpop.permute.xlu0 %1105 }
 0x4d0   :  { %v1110_v14 = vpop.permute.xlu1 %1109 }
 0x535   :  { %v2244_v10 = vpop.f32.mrf.mxu0 }
 0x536   :  { %v1051_v36 = vadd.f32 %v2244_v10, %v928_v33  ;;  %v1102_v10 = vpop.permute.xlu1 %1101  ;;  %v2596_v33 = vmov 7  }
 0x537   :  { %v1045_v16 = vpop.f32.mrf.mxu0  ;;  %2415 = vset.pattern.permute.xlu1 %v2596_v33  ;;  %2416 = vset.pattern.permute.xlu0 %v2596_v33 }
 0x538   :  { %v1046_v37 = vadd.f32 %v1045_v16, %v924_v35  ;;  %1483 = vperm.xlu1 %2415, %v2816_v45   ;;  %1479 = vperm.xlu0 %2416, %v2821_v46   ;;  %v2994_v35 = vld [vmem:[%s3103_s6 + $0x18] sm:$0xff] }
 0x539   :  { %v2247_v18 = vpop.f32.mrf.mxu0 }
 0x53a   :  { %v1061_v32 = vadd.f32 %v2247_v18, %v936_v26  ;;  %v1271_v26 = vld [vmem:[%s3102_s5 + $0x90] sm:$0xff] }
 0x53b   :  { %v1055_v19 = vpop.f32.mrf.mxu0 }
 0x53c   :  { %v1056_v34 = vadd.f32 %v1055_v19, %v932_v30  ;;  %v1275_v30 = vld [vmem:[%s3102_s5 + $0xb0] sm:$0xff]  ;;  %1467 = vperm.xlu0 %2416, %v2994_v35  }
 0x53d   :  { %v2250_v21 = vpop.f32.mrf.mxu0 }
 0x53e   :  { %v1071_v28 = vadd.f32 %v2250_v21, %v944_v20 }
 0x53f   :  { %v1065_v23 = vpop.f32.mrf.mxu0 }
 0x540   :  { %v1066_v31 = vadd.f32 %v1065_v23, %v940_v22 }
 0x541   :  { %v2253_v24 = vpop.f32.mrf.mxu0 }
 0x542   :  { %v1081_v25 = vadd.f32 %v2253_v24, %v952_v17 }
 0x543   :  { %v1075_v27 = vpop.f32.mrf.mxu0 }
 0x544   :  { %2481 = vtanh.f32 %v1081_v25  ;;  %v1076_v29 = vadd.f32 %v1075_v27, %v948_v15  ;;  %v1270_v25 = vld [vmem:[%s3102_s5 + $0x88] sm:$0xff]  ;;  %v1272_v27 = vld [vmem:[%s3102_s5 + $0x98] sm:$0xff] }
 0x546   :  { %2483 = vtanh.f32 %v1076_v29  ;;  %v1274_v29 = vld [vmem:[%s3102_s5 + $0xa8] sm:$0xff] }
 0x547   :  { %2485 = vtanh.f32 %v1071_v28  ;;  %v1273_v28 = vld [vmem:[%s3102_s5 + $0xa0] sm:$0xff] }
 0x548   :  { %2487 = vtanh.f32 %v1066_v31  ;;  %v1276_v31 = vld [vmem:[%s3102_s5 + $0xb8] sm:$0xff] }
 0x549   :  { %2489 = vtanh.f32 %v1061_v32  ;;  %v1446_v32 = vld [vmem:[%s3102_s5 + $0xc0] sm:$0xff] }
 0x54a   :  { %2491 = vtanh.f32 %v1056_v34  ;;  %v2988_v34 = vld [vmem:[%s3103_s6 + $0x28] sm:$0xff] }
 0x54b   :  { %2493 = vtanh.f32 %v1051_v36  ;;  %1475 = vperm.xlu1 %2415, %v2988_v34   ;;  %v3000_v36 = vld [vmem:[%s3103_s6 + $0x20] sm:$0xff] }
 0x54c   :  { %2495 = vtanh.f32 %v1046_v37  ;;  %v3006_v37 = vld [vmem:[%s3103_s6 + $0x8] sm:$0xff] }
 0x54d   :  { %1459 = vperm.xlu0 %2416, %v3006_v37  }
 0x54f   :  { %1471 = vperm.xlu1 %2415, %v3000_v36  }
 0x551   :  { %v2482_v38 = vpop.eup %2481 }
 0x552   :  { %2254 = vmatprep.subr.mxu1 %v2482_v38 }
 0x553   :  { %v2484_v39 = vpop.eup %2483  ;;  %2255 = vmatpush3.msra.mxu1 %v2482_v38  ;;  %v3012_v38 = vld [vmem:[%s3103_s6 + $0x10] sm:$0xff] }
 0x554   :  { %2256 = vmatprep.subr.mxu1 %v2484_v39  ;;  %v2486_v40 = vpop.eup %2485  ;;  %1463 = vperm.xlu1 %2415, %v3012_v38  }
 0x555   :  { %2257 = vmatpush3.msra.mxu1 %v2484_v39  ;;  %v2488_v41 = vpop.eup %2487  ;;  %v3018_v39 = vld [vmem:[%s3103_s6] sm:$0xff] }
 0x556   :  { %2258 = vmatprep.subr.mxu1 %v2486_v40  ;;  %v2490_v42 = vpop.eup %2489 }
 0x557   :  { %2259 = vmatpush3.msra.mxu1 %v2486_v40  ;;  %v2492_v43 = vpop.eup %2491 }
 0x558   :  { %2260 = vmatprep.subr.mxu1 %v2488_v41  ;;  %v2494_v44 = vpop.eup %2493  ;;  %1455 = vperm.xlu1 %2415, %v3018_v39  }
 0x559   :  { %2261 = vmatpush3.msra.mxu1 %v2488_v41  ;;  %v2496_v47 = vpop.eup %2495  ;;  %v1303_v41 = vpop.permute.xlu1 %1302 }
 0x55a   :  { %2262 = vmatprep.subr.mxu1 %v2490_v42 }
 0x55b   :  { %2263 = vmatpush3.msra.mxu1 %v2490_v42 }
 0x55c   :  { %2264 = vmatprep.subr.mxu1 %v2492_v43 }
 0x55d   :  { %2265 = vmatpush3.msra.mxu1 %v2492_v43  ;;  %v1307_v43 = vpop.permute.xlu0 %1306 }
 0x55e   :  { %2266 = vmatprep.subr.mxu1 %v2494_v44 }
 0x55f   :  { %2267 = vmatpush3.msra.mxu1 %v2494_v44 }
 0x560   :  { %2268 = vmatprep.subr.mxu1 %v2496_v47 }
 0x561   :  { %2269 = vmatpush3.msra.mxu1 %v2496_v47 }
 0x562   :  { %2271 = vmatmul.mubr.msk.f32.vlgmr.msra.gmra.mxu1 %vm954_vm4, %v1093_v48  ;;  %v1299_v48 = vpop.permute.xlu1 %1298 }
 0x563   :  { %2273 = vmatprep.mubr.msk.f32.mxu1 %vm954_vm4, %v1094_v49 }
 0x566   :  { %2274 = vmatmul.mubr.msk.f32.gmra.mxu1 %vm954_vm4, %v1095_v50  ;;  %v1295_v50 = vpop.permute.xlu0 %1294 }
 0x567   :  { %2276 = vmatprep.mubr.msk.f32.mxu1 %vm954_vm4, %v1096_v51 }
 0x56a   :  { %2277 = vmatmul.mubr.msk.f32.gmra.mxu1 %vm954_vm4, %v1097_v52 }
 0x56b   :  { %2279 = vmatprep.mubr.msk.f32.mxu1 %vm954_vm4, %v1098_v53 }
 0x56e   :  { %2280 = vmatmul.mubr.msk.f32.gmra.mxu1 %vm954_vm4, %v1099_v54  ;;  %v1291_v54 = vpop.permute.xlu1 %1290 }
 0x56f   :  { %2326 = vmatprep.mubr.msk.f32.mxu1 %vm954_vm4, %v1446_v32 }
 0x622   :  { %v2272_v58 = vpop.f32.mrf.mxu1 }
 0x623   :  { %v1228_v15 = vadd.f32 %v2272_v58, %v1106_v6  ;;  %v1287_v58 = vpop.permute.xlu0 %1286  ;;  %v1449_v6 = vld [vmem:[%s3102_s5 + $0xd8] sm:$0xff] }
 0x624   :  { %v1222_v59 = vpop.f32.mrf.mxu1 }
 0x625   :  { %v1223_v16 = vadd.f32 %v1222_v59, %v1102_v10  ;;  %v1451_v10 = vld [vmem:[%s3102_s5 + $0xe8] sm:$0xff] }
 0x626   :  { %v2275_v61 = vpop.f32.mrf.mxu1 }
 0x627   :  { %v1238_v13 = vadd.f32 %v2275_v61, %v1114_v3  ;;  %v1283_v61 = vpop.permute.xlu1 %1282 }
 0x628   :  { %v1232_v62 = vpop.f32.mrf.mxu1 }
 0x629   :  { %v1233_v7 = vadd.f32 %v1232_v62, %v1110_v14 }
 0x62a   :  { %v2278_v0 = vpop.f32.mrf.mxu1 }
 0x62b   :  { %v1248_v4 = vadd.f32 %v2278_v0, %v1122_v60 }
 0x62c   :  { %v1242_v11 = vpop.f32.mrf.mxu1 }
 0x62d   :  { %v1243_v5 = vadd.f32 %v1242_v11, %v1118_v1 }
 0x62e   :  { %v2281_v2 = vpop.f32.mrf.mxu1 }
 0x62f   :  { %v1258_v8 = vadd.f32 %v2281_v2, %v1130_v57 }
 0x630   :  { %v1252_v12 = vpop.f32.mrf.mxu1 }
 0x631   :  { %2497 = vtanh.f32 %v1258_v8  ;;  %v1253_v9 = vadd.f32 %v1252_v12, %v1126_v63  ;;  %v1279_v63 = vpop.permute.xlu0 %1278 }
 0x633   :  { %2499 = vtanh.f32 %v1253_v9 }
 0x634   :  { %2501 = vtanh.f32 %v1248_v4 }
 0x635   :  { %2503 = vtanh.f32 %v1243_v5  ;;  %v1447_v5 = vld [vmem:[%s3102_s5 + $0xc8] sm:$0xff] }
 0x636   :  { %2505 = vtanh.f32 %v1238_v13  ;;  %v1448_v13 = vld [vmem:[%s3102_s5 + $0xd0] sm:$0xff] }
 0x637   :  { %2507 = vtanh.f32 %v1233_v7  ;;  %v1450_v7 = vld [vmem:[%s3102_s5 + $0xe0] sm:$0xff] }
 0x638   :  { %2509 = vtanh.f32 %v1228_v15  ;;  %v1452_v15 = vld [vmem:[%s3102_s5 + $0xf0] sm:$0xff] }
 0x639   :  { %2511 = vtanh.f32 %v1223_v16  ;;  %v1453_v16 = vld [vmem:[%s3102_s5 + $0xf8] sm:$0xff] }
 0x63e   :  { %v2498_v17 = vpop.eup %2497 }
 0x63f   :  { %2282 = vmatprep.subr.mxu0 %v2498_v17 }
 0x640   :  { %v2500_v18 = vpop.eup %2499  ;;  %2283 = vmatpush3.msra.mxu0 %v2498_v17  ;;  %v1623_v17 = vld [vmem:[%s3102_s5 + $0x100] sm:$0xff] }
 0x641   :  { %2284 = vmatprep.subr.mxu0 %v2500_v18  ;;  %v2502_v19 = vpop.eup %2501 }
 0x642   :  { %2285 = vmatpush3.msra.mxu0 %v2500_v18  ;;  %v2504_v20 = vpop.eup %2503  ;;  %v2597_v18 = vmov 8  }
 0x643   :  { %2286 = vmatprep.subr.mxu0 %v2502_v19  ;;  %v2506_v21 = vpop.eup %2505  ;;  %2417 = vset.pattern.permute.xlu0 %v2597_v18 }
 0x644   :  { %2287 = vmatpush3.msra.mxu0 %v2502_v19  ;;  %v2508_v22 = vpop.eup %2507  ;;  %2418 = vset.pattern.permute.xlu1 %v2597_v18  ;;  %v1484_v19 = vpop.permute.xlu1 %1483 }
 0x645   :  { %2288 = vmatprep.subr.mxu0 %v2504_v20  ;;  %v2510_v23 = vpop.eup %2509  ;;  %1660 = vperm.xlu0 %2417, %v2816_v45  }
 0x646   :  { %2289 = vmatpush3.msra.mxu0 %v2504_v20  ;;  %v2512_v24 = vpop.eup %2511  ;;  %1656 = vperm.xlu1 %2418, %v2821_v46  }
 0x647   :  { %2290 = vmatprep.subr.mxu0 %v2506_v21 }
 0x648   :  { %2291 = vmatpush3.msra.mxu0 %v2506_v21 }
 0x649   :  { %2292 = vmatprep.subr.mxu0 %v2508_v22  ;;  %1648 = vperm.xlu0 %2417, %v3000_v36  }
 0x64a   :  { %2293 = vmatpush3.msra.mxu0 %v2508_v22  ;;  %1652 = vperm.xlu1 %2418, %v2988_v34   ;;  %v1476_v22 = vpop.permute.xlu1 %1475 }
 0x64b   :  { %2294 = vmatprep.subr.mxu0 %v2510_v23 }
 0x64c   :  { %2295 = vmatpush3.msra.mxu0 %v2510_v23 }
 0x64d   :  { %2296 = vmatprep.subr.mxu0 %v2512_v24  ;;  %1640 = vperm.xlu0 %2417, %v3012_v38  }
 0x64e   :  { %2297 = vmatpush3.msra.mxu0 %v2512_v24  ;;  %1644 = vperm.xlu1 %2418, %v2994_v35   ;;  %v1480_v24 = vpop.permute.xlu0 %1479 }
 0x64f   :  { %2299 = vmatmul.mubr.msk.f32.vlgmr.msra.gmra.mxu0 %vm954_vm4, %v1270_v25  ;;  %v1472_v25 = vpop.permute.xlu1 %1471 }
 0x650   :  { %2301 = vmatprep.mubr.msk.f32.mxu0 %vm954_vm4, %v1271_v26 }
 0x651   :  { %1632 = vperm.xlu0 %2417, %v3018_v39  }
 0x652   :  { %1636 = vperm.xlu1 %2418, %v3006_v37  }
 0x653   :  { %2302 = vmatmul.mubr.msk.f32.gmra.mxu0 %vm954_vm4, %v1272_v27  ;;  %v1464_v33 = vpop.permute.xlu1 %1463 }
 0x654   :  { %2304 = vmatprep.mubr.msk.f32.mxu0 %vm954_vm4, %v1273_v28 }
 0x657   :  { %2305 = vmatmul.mubr.msk.f32.gmra.mxu0 %vm954_vm4, %v1274_v29  ;;  %v1468_v29 = vpop.permute.xlu0 %1467  ;;  %v1456_v38 = vpop.permute.xlu1 %1455 }
 0x658   :  { %2307 = vmatprep.mubr.msk.f32.mxu0 %vm954_vm4, %v1275_v30 }
 0x65b   :  { %2308 = vmatmul.mubr.msk.f32.gmra.mxu0 %vm954_vm4, %v1276_v31  ;;  %v1460_v36 = vpop.permute.xlu0 %1459 }
 0x65c   :  { %2354 = vmatprep.mubr.msk.f32.mxu0 %vm954_vm4, %v1623_v17 }
 0x70f   :  { %v2300_v40 = vpop.f32.mrf.mxu0 }
 0x710   :  { %v1405_v0 = vadd.f32 %v2300_v40, %v1283_v61 }
 0x711   :  { %v1399_v42 = vpop.f32.mrf.mxu0 }
 0x712   :  { %v1400_v1 = vadd.f32 %v1399_v42, %v1279_v63 }
 0x713   :  { %v2303_v44 = vpop.f32.mrf.mxu0 }
 0x714   :  { %v1415_v60 = vadd.f32 %v2303_v44, %v1291_v54  ;;  %v1626_v54 = vld [vmem:[%s3102_s5 + $0x118] sm:$0xff] }
 0x715   :  { %v1409_v47 = vpop.f32.mrf.mxu0 }
 0x716   :  { %v1410_v62 = vadd.f32 %v1409_v47, %v1287_v58  ;;  %v1630_v58 = vld [vmem:[%s3102_s5 + $0x138] sm:$0xff] }
 0x717   :  { %v2306_v49 = vpop.f32.mrf.mxu0 }
 0x718   :  { %v1425_v56 = vadd.f32 %v2306_v49, %v1299_v48 }
 0x719   :  { %v1419_v51 = vpop.f32.mrf.mxu0 }
 0x71a   :  { %v1420_v59 = vadd.f32 %v1419_v51, %v1295_v50 }
 0x71b   :  { %v2309_v52 = vpop.f32.mrf.mxu0 }
 0x71c   :  { %v1435_v53 = vadd.f32 %v2309_v52, %v1307_v43  ;;  %v1624_v52 = vld [vmem:[%s3102_s5 + $0x108] sm:$0xff] }
 0x71d   :  { %v1429_v55 = vpop.f32.mrf.mxu0 }
 0x71e   :  { %2513 = vtanh.f32 %v1435_v53  ;;  %v1430_v57 = vadd.f32 %v1429_v55, %v1303_v41  ;;  %v1625_v53 = vld [vmem:[%s3102_s5 + $0x110] sm:$0xff]  ;;  %v1627_v55 = vld [vmem:[%s3102_s5 + $0x120] sm:$0xff] }
 0x720   :  { %2515 = vtanh.f32 %v1430_v57  ;;  %v1629_v57 = vld [vmem:[%s3102_s5 + $0x130] sm:$0xff] }
 0x721   :  { %2517 = vtanh.f32 %v1425_v56  ;;  %v1628_v56 = vld [vmem:[%s3102_s5 + $0x128] sm:$0xff] }
 0x722   :  { %2519 = vtanh.f32 %v1420_v59  ;;  %v2598_v59 = vmov 0.0  }
 0x723   :  { %2521 = vtanh.f32 %v1415_v60  ;;  %v2600_v60 = vmov 9  }
 0x724   :  { %2523 = vtanh.f32 %v1410_v62  ;;  %2419 = vset.pattern.permute.xlu1 %v2600_v60  ;;  %2420 = vset.pattern.permute.xlu0 %v2600_v60  ;;  %v1657_v62 = vpop.permute.xlu1 %1656 }
 0x725   :  { %2525 = vtanh.f32 %v1405_v0  ;;  %1875 = vperm.xlu1 %2419, %v3018_v39   ;;  %v1661_v0 = vpop.permute.xlu0 %1660 }
 0x726   :  { %2527 = vtanh.f32 %v1400_v1 }
 0x72b   :  { %v2514_v11 = vpop.eup %2513 }
 0x72c   :  { %2310 = vmatprep.subr.mxu1 %v2514_v11 }
 0x72d   :  { %v2516_v2 = vpop.eup %2515  ;;  %2311 = vmatpush3.msra.mxu1 %v2514_v11 }
 0x72e   :  { %2312 = vmatprep.subr.mxu1 %v2516_v2  ;;  %v2518_v8 = vpop.eup %2517 }
 0x72f   :  { %2313 = vmatpush3.msra.mxu1 %v2516_v2  ;;  %v2520_v3 = vpop.eup %2519  ;;  %v1653_v2 = vpop.permute.xlu1 %1652 }
 0x730   :  { %2314 = vmatprep.subr.mxu1 %v2518_v8  ;;  %v2522_v12 = vpop.eup %2521 }
 0x731   :  { %2315 = vmatpush3.msra.mxu1 %v2518_v8  ;;  %v2524_v4 = vpop.eup %2523 }
 0x732   :  { %2316 = vmatprep.subr.mxu1 %v2520_v3  ;;  %v2526_v9 = vpop.eup %2525 }
 0x733   :  { %2317 = vmatpush3.msra.mxu1 %v2520_v3  ;;  %v2528_v14 = vpop.eup %2527  ;;  %v1649_v3 = vpop.permute.xlu0 %1648 }
 0x734   :  { %2318 = vmatprep.subr.mxu1 %v2522_v12 }
 0x735   :  { %2319 = vmatpush3.msra.mxu1 %v2522_v12 }
 0x736   :  { %2320 = vmatprep.subr.mxu1 %v2524_v4 }
 0x737   :  { %2321 = vmatpush3.msra.mxu1 %v2524_v4 }
 0x738   :  { %2322 = vmatprep.subr.mxu1 %v2526_v9 }
 0x739   :  { %2323 = vmatpush3.msra.mxu1 %v2526_v9 }
 0x73a   :  { %2324 = vmatprep.subr.mxu1 %v2528_v14 }
 0x73b   :  { %2325 = vmatpush3.msra.mxu1 %v2528_v14  ;;  %v1645_v14 = vpop.permute.xlu1 %1644 }
 0x73c   :  { %2327 = vmatmul.mubr.msk.f32.vlgmr.msra.gmra.mxu1 %vm954_vm4, %v1447_v5  ;;  %2366 = vmatprep.subr.mxu1 %v2598_v59 }
 0x73d   :  { %2329 = vmatprep.mubr.msk.f32.mxu1 %vm954_vm4, %v1448_v13 }
 0x740   :  { %2330 = vmatmul.mubr.msk.f32.gmra.mxu1 %vm954_vm4, %v1449_v6 }
 0x741   :  { %2332 = vmatprep.mubr.msk.f32.mxu1 %vm954_vm4, %v1450_v7  ;;  %v1641_v7 = vpop.permute.xlu0 %1640 }
 0x744   :  { %2333 = vmatmul.mubr.msk.f32.gmra.mxu1 %vm954_vm4, %v1451_v10 }
 0x745   :  { %2335 = vmatprep.mubr.msk.f32.mxu1 %vm954_vm4, %v1452_v15  ;;  %v1637_v15 = vpop.permute.xlu1 %1636  ;;  %v1633_v17 = vpop.permute.xlu0 %1632 }
 0x748   :  { %2336 = vmatmul.mubr.msk.f32.gmra.mxu1 %vm954_vm4, %v1453_v16 }
 0x749   :  { %2382 = vmatprep.mubr.msk.f32.mxu1 %vm2599_vm5, %v2598_v59 }
 0x7fc   :  { %v2328_v20 = vpop.f32.mrf.mxu1 }
 0x7fd   :  { %v1582_v40 = vadd.f32 %v2328_v20, %v1460_v36 }
 0x7fe   :  { %v1576_v21 = vpop.f32.mrf.mxu1 }
 0x7ff   :  { %v1577_v41 = vadd.f32 %v1576_v21, %v1456_v38 }
 0x800   :  { %v2331_v23 = vpop.f32.mrf.mxu1 }
 0x801   :  { %v1592_v35 = vadd.f32 %v2331_v23, %v1468_v29 }
 0x802   :  { %v1586_v45 = vpop.f32.mrf.mxu1 }
 0x803   :  { %v1587_v37 = vadd.f32 %v1586_v45, %v1464_v33 }
 0x804   :  { %v2334_v46 = vpop.f32.mrf.mxu1 }
 0x805   :  { %v1602_v31 = vadd.f32 %v2334_v46, %v1476_v22 }
 0x806   :  { %v1596_v26 = vpop.f32.mrf.mxu1 }
 0x807   :  { %v1597_v34 = vadd.f32 %v1596_v26, %v1472_v25  ;;  %v1800_v25 = vld [vmem:[%s3102_s5 + $0x140] sm:$0xff] }
 0x808   :  { %v2337_v27 = vpop.f32.mrf.mxu1 }
 0x809   :  { %v1612_v28 = vadd.f32 %v2337_v27, %v1484_v19  ;;  %v1876_v27 = vpop.permute.xlu1 %1875 }
 0x80a   :  { %v1606_v30 = vpop.f32.mrf.mxu1 }
 0x80b   :  { %2529 = vtanh.f32 %v1612_v28  ;;  %v1607_v32 = vadd.f32 %v1606_v30, %v1480_v24 }
 0x80d   :  { %2531 = vtanh.f32 %v1607_v32 }
 0x80e   :  { %2533 = vtanh.f32 %v1602_v31 }
 0x80f   :  { %2535 = vtanh.f32 %v1597_v34 }
 0x810   :  { %2537 = vtanh.f32 %v1592_v35 }
 0x811   :  { %2539 = vtanh.f32 %v1587_v37 }
 0x812   :  { %2541 = vtanh.f32 %v1582_v40 }
 0x813   :  { %2543 = vtanh.f32 %v1577_v41 }
 0x818   :  { %v2530_v42 = vpop.eup %2529 }
 0x819   :  { %2338 = vmatprep.subr.mxu0 %v2530_v42 }
 0x81a   :  { %v2532_v43 = vpop.eup %2531  ;;  %2339 = vmatpush3.msra.mxu0 %v2530_v42 }
 0x81b   :  { %2340 = vmatprep.subr.mxu0 %v2532_v43  ;;  %v2534_v44 = vpop.eup %2533 }
 0x81c   :  { %2341 = vmatpush3.msra.mxu0 %v2532_v43  ;;  %v2536_v47 = vpop.eup %2535 }
 0x81d   :  { %2342 = vmatprep.subr.mxu0 %v2534_v44  ;;  %v2538_v48 = vpop.eup %2537 }
 0x81e   :  { %2343 = vmatpush3.msra.mxu0 %v2534_v44  ;;  %v2540_v49 = vpop.eup %2539 }
 0x81f   :  { %2344 = vmatprep.subr.mxu0 %v2536_v47  ;;  %v2542_v50 = vpop.eup %2541 }
 0x820   :  { %2345 = vmatpush3.msra.mxu0 %v2536_v47  ;;  %v2544_v51 = vpop.eup %2543 }
 0x821   :  { %2346 = vmatprep.subr.mxu0 %v2538_v48 }
 0x822   :  { %2347 = vmatpush3.msra.mxu0 %v2538_v48 }
 0x823   :  { %2348 = vmatprep.subr.mxu0 %v2540_v49 }
 0x824   :  { %2349 = vmatpush3.msra.mxu0 %v2540_v49 }
 0x825   :  { %2350 = vmatprep.subr.mxu0 %v2542_v50 }
 0x826   :  { %2351 = vmatpush3.msra.mxu0 %v2542_v50 }
 0x827   :  { %2352 = vmatprep.subr.mxu0 %v2544_v51 }
 0x828   :  { %2353 = vmatpush3.msra.mxu0 %v2544_v51 }
 0x829   :  { %2355 = vmatmul.mubr.msk.f32.vlgmr.msra.gmra.mxu0 %vm954_vm4, %v1624_v52 }
 0x82a   :  { %2357 = vmatprep.mubr.msk.f32.mxu0 %vm954_vm4, %v1625_v53 }
 0x82d   :  { %2358 = vmatmul.mubr.msk.f32.gmra.mxu0 %vm954_vm4, %v1626_v54 }
 0x82e   :  { %2360 = vmatprep.mubr.msk.f32.mxu0 %vm954_vm4, %v1627_v55 }
 0x831   :  { %2361 = vmatmul.mubr.msk.f32.gmra.mxu0 %vm954_vm4, %v1628_v56 }
 0x832   :  { %2363 = vmatprep.mubr.msk.f32.mxu0 %vm954_vm4, %v1629_v57 }
 0x835   :  { %2364 = vmatmul.mubr.msk.f32.gmra.mxu0 %vm954_vm4, %v1630_v58 }
 0x8e9   :  { %v2356_v61 = vpop.f32.mrf.mxu0 }
 0x8ea   :  { %v1759_v18 = vadd.f32 %v2356_v61, %v1637_v15 }
 0x8eb   :  { %v1753_v63 = vpop.f32.mrf.mxu0 }
 0x8ec   :  { %v1754_v19 = vadd.f32 %v1753_v63, %v1633_v17 }
 0x8ed   :  { %v2359_v1 = vpop.f32.mrf.mxu0 }
 0x8ee   :  { %v1769_v39 = vadd.f32 %v2359_v1, %v1645_v14 }
 0x8ef   :  { %v1763_v11 = vpop.f32.mrf.mxu0 }
 0x8f0   :  { %v1764_v16 = vadd.f32 %v1763_v11, %v1641_v7 }
 0x8f1   :  { %v2362_v8 = vpop.f32.mrf.mxu0 }
 0x8f2   :  { %v1779_v13 = vadd.f32 %v2362_v8, %v1653_v2 }
 0x8f3   :  { %v1773_v12 = vpop.f32.mrf.mxu0 }
 0x8f4   :  { %v1774_v10 = vadd.f32 %v1773_v12, %v1649_v3 }
 0x8f5   :  { %v2365_v4 = vpop.f32.mrf.mxu0 }
 0x8f6   :  { %v1789_v9 = vadd.f32 %v2365_v4, %v1661_v0 }
 0x8f7   :  { %v1783_v5 = vpop.f32.mrf.mxu0 }
 0x8f8   :  { %2545 = vtanh.f32 %v1789_v9  ;;  %v1784_v6 = vadd.f32 %v1783_v5, %v1657_v62 }
 0x8fa   :  { %2547 = vtanh.f32 %v1784_v6 }
 0x8fb   :  { %2549 = vtanh.f32 %v1779_v13 }
 0x8fc   :  { %2551 = vtanh.f32 %v1774_v10 }
 0x8fd   :  { %2553 = vtanh.f32 %v1769_v39 }
 0x8fe   :  { %2555 = vtanh.f32 %v1764_v16 }
 0x8ff   :  { %2557 = vtanh.f32 %v1759_v18 }
 0x900   :  { %2559 = vtanh.f32 %v1754_v19 }
 0x905   :  { %v2546_v20 = vpop.eup %2545 }
 0x906   :  { %2367 = vmatpush3.msra.mxu1 %v2546_v20 }
 0x907   :  { %v2548_v21 = vpop.eup %2547  ;;  %2368 = vmatprep.subr.mxu1 %v2598_v59 }
 0x908   :  { %2369 = vmatpush3.msra.mxu1 %v2548_v21  ;;  %v2550_v22 = vpop.eup %2549 }
 0x909   :  { %2370 = vmatprep.subr.mxu1 %v2598_v59  ;;  %v2552_v23 = vpop.eup %2551 }
 0x90a   :  { %2371 = vmatpush3.msra.mxu1 %v2550_v22  ;;  %v2554_v45 = vpop.eup %2553 }
 0x90b   :  { %2372 = vmatprep.subr.mxu1 %v2598_v59  ;;  %v2556_v24 = vpop.eup %2555 }
 0x90c   :  { %2373 = vmatpush3.msra.mxu1 %v2552_v23  ;;  %v2558_v46 = vpop.eup %2557 }
 0x90d   :  { %2374 = vmatprep.subr.mxu1 %v2598_v59  ;;  %v2560_v26 = vpop.eup %2559 }
 0x90e   :  { %2375 = vmatpush3.msra.mxu1 %v2554_v45 }
 0x90f   :  { %2376 = vmatprep.subr.mxu1 %v2598_v59 }
 0x910   :  { %2377 = vmatpush3.msra.mxu1 %v2556_v24 }
 0x911   :  { %2378 = vmatprep.subr.mxu1 %v2598_v59 }
 0x912   :  { %2379 = vmatpush3.msra.mxu1 %v2558_v46 }
 0x913   :  { %2380 = vmatprep.subr.mxu1 %v2598_v59 }
 0x914   :  { %2381 = vmatpush3.msra.mxu1 %v2560_v26 }
 0x915   :  { %2383 = vmatmul.mubr.msk.f32.vlgmr.msra.gmra.mxu1 %vm954_vm4, %v1800_v25 }
 0x9d5   :  { %v1870_v28 = vpop.f32.mrf.mxu1 }
 0x9d6   :  { %v1878_v29 = vadd.f32 %v1876_v27, %v1870_v28 }
 0x9d7   :  { %v2384_v30 = vpop.f32.mrf.mxu1 }
 0x9d8   :  { %1879 = vst [vmem:[#allocation2] sm:$0x1] %v1878_v29 }
 0x9d9   :  { %2578 = shalt.err (!%p2575_p4)
}
 0x9da   :  { %1889 = dma.vmem_to_hbm [thread:$0]  %s1887_s23, 16, %s3104_s7, [#allocation3]  }
 0x9db   :  { %2587 = dma.done.wait [#allocation3], 16  }
 0x9dc   :  { %2588 = vsyncadd [#allocation3], 4294967280 }
 0x9dd   :  { %1893 = vsyncpa [#allocation3], 1 }

</bundles_post_ra>
